<compile_context>
chip_gen: v6e
topology: v6e:2x2x1
jax: 0.10.0
libtpu: 0.0.40
codegen_flags: <defaults>
</compile_context>

<pallas_src>
import functools
import math

import jax
import jax.numpy as jnp
from jax import lax
from jax.experimental import pallas as pl
from jax.experimental.pallas import tpu as pltpu

# Deterministic "config" (stands in for the PyTorch module's __init__ args).
CONFIG = {
    "quantum_efficiency": 0.9,
    "dark_current_mean": 2.0,
    "read_noise_std": 1.5,
    "camera_gain": 0.5,
    "camera_max_adu": 4095.0,
}

_TILE_M_MAX = 512          # max sublane rows per block
_TWO_PI = 2.0 * math.pi

# murmur3 / splitmix-style 32-bit mixing constants.
_GOLD = 0x9E3779B9
_C1 = 0x85EBCA6B
_C2 = 0xC2B2AE35


def _fmix32(h):
    """murmur3 finalizer on uint32 arrays (pure VPU bit ops, wraps mod 2^32)."""
    h = h ^ (h >> 16)
    h = h * jnp.uint32(_C1)
    h = h ^ (h >> 13)
    h = h * jnp.uint32(_C2)
    h = h ^ (h >> 16)
    return h


def _bits_to_unit(h):
    """uint32 bits -> uniform float32 in (0, 1] (top 23 bits)."""
    bits = (h >> 9).astype(jnp.int32)                       # [0, 2^23)
    return (bits.astype(jnp.float32) + 1.0) * jnp.float32(1.0 / (1 << 23))


def _noise_kernel(seed_ref, x_ref, o_ref, *, qe, dark_mean, read_std, gain,
                  max_adu, tile_m, lane_w):
    # Per-tile linear element index: vector part built once, scalar tile base
    # folded into the hash's additive constant (scalar math, one fewer vadd).
    rows = lax.broadcasted_iota(jnp.int32, (tile_m, lane_w), 0)
    cols = lax.broadcasted_iota(jnp.int32, (tile_m, lane_w), 1)
    lin = rows * lane_w + cols                     # lane_w is a power of two

    # TODO(synk): flat index wraps mod 2^32 for tensors with >2^31 elements.
    base = pl.program_id(0) * (tile_m * lane_w)
    seed_u = seed_ref[0].astype(jnp.uint32)
    add_c = base.astype(jnp.uint32) * jnp.uint32(_GOLD) + seed_u   # scalar

    c = lin.astype(jnp.uint32) * jnp.uint32(_GOLD) + add_c
    h1 = _fmix32(c)
    # Cheap 2-op remix for the second stream (h1 is already well mixed).
    h2 = h1 * jnp.uint32(_C2) ^ (h1 >> 15)

    u1 = _bits_to_unit(h1)          # (0, 1]
    u2 = _bits_to_unit(h2)

    # Box-Muller: one (log, sqrt, cos, sin) -> two N(0,1) draws per element.
    r = jnp.sqrt(jnp.float32(-2.0) * jnp.log(u1))
    theta = jnp.float32(_TWO_PI) * u2
    z_dark = r * jnp.cos(theta)
    z_shot = r * jnp.sin(theta)

    x = x_ref[...].astype(jnp.float32)

    # signal electrons
    signal_electrons_mean = x * jnp.float32(qe)

    # dark current (Gaussian approx of Poisson)
    dark_electrons = jnp.float32(dark_mean) + z_dark * jnp.float32(
        math.sqrt(dark_mean))

    total_electrons_mean = jnp.maximum(
        signal_electrons_mean + dark_electrons, 0.0)

    # photon (shot) noise N(0, sqrt(total)) + read noise N(0, read_std),
    # folded analytically into a single Gaussian draw (exact).
    combined_std = jnp.sqrt(total_electrons_mean +
                            jnp.float32(read_std * read_std))
    electrons_after_noise = total_electrons_mean + z_shot * combined_std

    # convert to ADU and clamp
    adu = jnp.clip(electrons_after_noise * jnp.float32(gain),
                   0.0, jnp.float32(max_adu))
    o_ref[...] = adu


def _pick_tiling(total):
    """Copy-free layout: (lane_w, tile_m, m) with m*lane_w == total and a
    TPU-legal block, or None if the shape needs the padded fallback."""
    for lane_w in (1024, 512, 256, 128):
        if total % lane_w:
            continue
        m = total // lane_w
        if m <= _TILE_M_MAX:
            return lane_w, m, m               # single block == full array
        t = _TILE_M_MAX
        while t >= 8:                          # tile_m multiple of 8, divides m
            if m % t == 0:
                return lane_w, t, m
            t -= 8
    return None


def _padded_tiling(total):
    """Fallback layout for ragged sizes (requires pad + slice copies)."""
    lane_w = 512
    m_total = -(-total // lane_w)
    if m_total <= _TILE_M_MAX:
        return lane_w, m_total, m_total
    tile_m = _TILE_M_MAX
    m_pad = -(-m_total // tile_m) * tile_m
    return lane_w, tile_m, m_pad


def noise_layer(x, seed, config=CONFIG):
    """Pallas implementation of NoiseLayer.forward.

    Args:
      x: array of photon counts (any float/int dtype; e.g. NCHW image volume).
      seed: int PRNG seed.
    Returns:
      float32 array, same shape as x, noisy image in ADU.
    """
    orig_shape = x.shape
    total = math.prod(orig_shape) if orig_shape else 1

    pick = _pick_tiling(total)
    if pick is not None:
        lane_w, tile_m, m = pick
        x2 = x.reshape(m, lane_w)              # free reshape: no cast, no pad
        padded = False
    else:
        lane_w, tile_m, m = _padded_tiling(total)
        flat = x.reshape(-1)
        flat = jnp.pad(flat, (0, m * lane_w - total))
        x2 = flat.reshape(m, lane_w)
        padded = True

    kernel = functools.partial(
        _noise_kernel,
        qe=float(config["quantum_efficiency"]),
        dark_mean=float(config["dark_current_mean"]),
        read_std=float(config["read_noise_std"]),
        gain=float(config["camera_gain"]),
        max_adu=float(config["camera_max_adu"]),
        tile_m=tile_m,
        lane_w=lane_w,
    )

    n_elems = m * lane_w
    in_bytes = n_elems * jnp.dtype(x2.dtype).itemsize
    grid = (m // tile_m,)

    out2 = pl.pallas_call(
        kernel,
        out_shape=jax.ShapeDtypeStruct((m, lane_w), jnp.float32),
        grid_spec=pltpu.PrefetchScalarGridSpec(
            num_scalar_prefetch=1,
            grid=grid,
            in_specs=[pl.BlockSpec((tile_m, lane_w),
                                   lambda i, seed_ref: (i, 0))],
            out_specs=pl.BlockSpec((tile_m, lane_w),
                                   lambda i, seed_ref: (i, 0)),
        ),
        compiler_params=pltpu.CompilerParams(
            dimension_semantics=("parallel",)),
        cost_estimate=pl.CostEstimate(
            flops=int(45 * n_elems),
            transcendentals=int(5 * n_elems),
            bytes_accessed=int(in_bytes + 4 * n_elems)),
    )(jnp.array([seed], dtype=jnp.int32), x2)

    if padded:
        return out2.reshape(-1)[:total].reshape(orig_shape)
    return out2.reshape(orig_shape)


if __name__ == "__main__":
    key = jax.random.PRNGKey(0)
    # Small NCHW image volume of "photon counts".
    x = jax.random.uniform(key, (2, 4, 16, 16), dtype=jnp.float32) * 100.0

    out = noise_layer(x, seed=0)
    out = jax.block_until_ready(out)

    assert out.shape == x.shape
    assert out.dtype == jnp.float32
    assert bool(jnp.all(jnp.isfinite(out)))
    # sanity: values clamped to [0, camera_max_adu]
    assert float(jnp.min(out)) >= 0.0
    assert float(jnp.max(out)) <= CONFIG["camera_max_adu"]

    print("KERNEL_OK")
</pallas_src>

<mosaic_0001>
module attributes {stable_mosaic.version = 11 : i64} {
  func.func @_noise_kernel(%arg0: i32, %arg1: memref<1xi32, #tpu.memory_space<smem>>, %arg2: memref<2x1024xf32, #tpu.memory_space<vmem>>, %arg3: memref<2x1024xf32, #tpu.memory_space<vmem>>) attributes {dimension_semantics = [#tpu.dimension_semantics<parallel>], iteration_bounds = array<i64: 1>, scalar_prefetch = 1 : i64, scratch_operands = 0 : i64, tpu.core_type = #tpu.core_type<tc>, window_params = [{transform_indices = @transform_0, window_bounds = array<i64: 2, 1024>}, {transform_indices = @transform_1, window_bounds = array<i64: 2, 1024>}]} {
    %0 = tpu.iota {dimensions = array<i32: 0>} : vector<2x1024xi32>
    %1 = tpu.iota {dimensions = array<i32: 1>} : vector<2x1024xi32>
    %c1024_i32 = arith.constant 1024 : i32
    %2 = vector.broadcast %c1024_i32 : i32 to vector<2x1024xi32>
    %3 = arith.muli %0, %2 : vector<2x1024xi32>
    %4 = arith.addi %3, %1 : vector<2x1024xi32>
    %c2048_i32 = arith.constant 2048 : i32
    %5 = arith.muli %arg0, %c2048_i32 : i32
    %c0 = arith.constant 0 : index
    %6 = memref.load %arg1[%c0] : memref<1xi32, #tpu.memory_space<smem>>
    %c-1640531527_i32 = arith.constant -1640531527 : i32
    %7 = arith.muli %5, %c-1640531527_i32 : i32
    %8 = arith.addi %7, %6 : i32
    %c-1640531527_i32_0 = arith.constant -1640531527 : i32
    %9 = vector.broadcast %c-1640531527_i32_0 : i32 to vector<2x1024xi32>
    %10 = arith.muli %4, %9 : vector<2x1024xi32>
    %11 = vector.broadcast %8 : i32 to vector<2x1024xi32>
    %12 = arith.addi %10, %11 : vector<2x1024xi32>
    %c16_i32 = arith.constant 16 : i32
    %13 = vector.broadcast %c16_i32 : i32 to vector<2x1024xi32>
    %14 = arith.shrui %12, %13 : vector<2x1024xi32>
    %15 = arith.xori %12, %14 : vector<2x1024xi32>
    %c-2048144789_i32 = arith.constant -2048144789 : i32
    %16 = vector.broadcast %c-2048144789_i32 : i32 to vector<2x1024xi32>
    %17 = arith.muli %15, %16 : vector<2x1024xi32>
    %c13_i32 = arith.constant 13 : i32
    %18 = vector.broadcast %c13_i32 : i32 to vector<2x1024xi32>
    %19 = arith.shrui %17, %18 : vector<2x1024xi32>
    %20 = arith.xori %17, %19 : vector<2x1024xi32>
    %c-1028477387_i32 = arith.constant -1028477387 : i32
    %21 = vector.broadcast %c-1028477387_i32 : i32 to vector<2x1024xi32>
    %22 = arith.muli %20, %21 : vector<2x1024xi32>
    %c16_i32_1 = arith.constant 16 : i32
    %23 = vector.broadcast %c16_i32_1 : i32 to vector<2x1024xi32>
    %24 = arith.shrui %22, %23 : vector<2x1024xi32>
    %25 = arith.xori %22, %24 : vector<2x1024xi32>
    %c-1028477387_i32_2 = arith.constant -1028477387 : i32
    %26 = vector.broadcast %c-1028477387_i32_2 : i32 to vector<2x1024xi32>
    %27 = arith.muli %25, %26 : vector<2x1024xi32>
    %c15_i32 = arith.constant 15 : i32
    %28 = vector.broadcast %c15_i32 : i32 to vector<2x1024xi32>
    %29 = arith.shrui %25, %28 : vector<2x1024xi32>
    %30 = arith.xori %27, %29 : vector<2x1024xi32>
    %c9_i32 = arith.constant 9 : i32
    %31 = vector.broadcast %c9_i32 : i32 to vector<2x1024xi32>
    %32 = arith.shrui %25, %31 : vector<2x1024xi32>
    %33 = arith.sitofp %32 : vector<2x1024xi32> to vector<2x1024xf32>
    %cst = arith.constant 1.000000e+00 : f32
    %34 = vector.broadcast %cst : f32 to vector<2x1024xf32>
    %35 = arith.addf %33, %34 : vector<2x1024xf32>
    %cst_3 = arith.constant 1.1920929E-7 : f32
    %36 = vector.broadcast %cst_3 : f32 to vector<2x1024xf32>
    %37 = arith.mulf %35, %36 : vector<2x1024xf32>
    %c9_i32_4 = arith.constant 9 : i32
    %38 = vector.broadcast %c9_i32_4 : i32 to vector<2x1024xi32>
    %39 = arith.shrui %30, %38 : vector<2x1024xi32>
    %40 = arith.sitofp %39 : vector<2x1024xi32> to vector<2x1024xf32>
    %cst_5 = arith.constant 1.000000e+00 : f32
    %41 = vector.broadcast %cst_5 : f32 to vector<2x1024xf32>
    %42 = arith.addf %40, %41 : vector<2x1024xf32>
    %cst_6 = arith.constant 1.1920929E-7 : f32
    %43 = vector.broadcast %cst_6 : f32 to vector<2x1024xf32>
    %44 = arith.mulf %42, %43 : vector<2x1024xf32>
    %45 = math.log %37 : vector<2x1024xf32>
    %cst_7 = arith.constant -2.000000e+00 : f32
    %46 = vector.broadcast %cst_7 : f32 to vector<2x1024xf32>
    %47 = arith.mulf %46, %45 : vector<2x1024xf32>
    %48 = math.sqrt %47 : vector<2x1024xf32>
    %cst_8 = arith.constant 6.28318548 : f32
    %49 = vector.broadcast %cst_8 : f32 to vector<2x1024xf32>
    %50 = arith.mulf %49, %44 : vector<2x1024xf32>
    %51 = math.cos %50 : vector<2x1024xf32>
    %52 = arith.mulf %48, %51 : vector<2x1024xf32>
    %53 = math.sin %50 : vector<2x1024xf32>
    %54 = arith.mulf %48, %53 : vector<2x1024xf32>
    %c0_9 = arith.constant 0 : index
    %c0_10 = arith.constant 0 : index
    %55 = vector.load %arg2[%c0_9, %c0_10] : memref<2x1024xf32, #tpu.memory_space<vmem>>, vector<2x1024xf32>
    %cst_11 = arith.constant 0.899999976 : f32
    %56 = vector.broadcast %cst_11 : f32 to vector<2x1024xf32>
    %57 = arith.mulf %55, %56 : vector<2x1024xf32>
    %cst_12 = arith.constant 1.41421354 : f32
    %58 = vector.broadcast %cst_12 : f32 to vector<2x1024xf32>
    %59 = arith.mulf %52, %58 : vector<2x1024xf32>
    %cst_13 = arith.constant 2.000000e+00 : f32
    %60 = vector.broadcast %cst_13 : f32 to vector<2x1024xf32>
    %61 = arith.addf %60, %59 : vector<2x1024xf32>
    %62 = arith.addf %57, %61 : vector<2x1024xf32>
    %cst_14 = arith.constant 0.000000e+00 : f32
    %63 = vector.broadcast %cst_14 : f32 to vector<2x1024xf32>
    %64 = arith.maximumf %62, %63 : vector<2x1024xf32>
    %cst_15 = arith.constant 2.250000e+00 : f32
    %65 = vector.broadcast %cst_15 : f32 to vector<2x1024xf32>
    %66 = arith.addf %64, %65 : vector<2x1024xf32>
    %67 = math.sqrt %66 : vector<2x1024xf32>
    %68 = arith.mulf %54, %67 : vector<2x1024xf32>
    %69 = arith.addf %64, %68 : vector<2x1024xf32>
    %cst_16 = arith.constant 5.000000e-01 : f32
    %70 = vector.broadcast %cst_16 : f32 to vector<2x1024xf32>
    %71 = arith.mulf %69, %70 : vector<2x1024xf32>
    %cst_17 = arith.constant 0.000000e+00 : f32
    %cst_18 = arith.constant 4.095000e+03 : f32
    %72 = vector.broadcast %cst_17 : f32 to vector<2x1024xf32>
    %73 = arith.maximumf %72, %71 : vector<2x1024xf32>
    %74 = vector.broadcast %cst_18 : f32 to vector<2x1024xf32>
    %75 = arith.minimumf %74, %73 : vector<2x1024xf32>
    %c0_19 = arith.constant 0 : index
    %c0_20 = arith.constant 0 : index
    %76 = vector.load %arg3[%c0_19, %c0_20] : memref<2x1024xf32, #tpu.memory_space<vmem>>, vector<2x1024xf32>
    tpu.vector_store %arg3[%c0_19, %c0_20], %75 {strides = array<i32>} : memref<2x1024xf32, #tpu.memory_space<vmem>>, vector<2x1024xf32>,
    return
  }
  func.func @transform_0(%arg0: i32, %arg1: memref<1xi32, #tpu.memory_space<smem>>) -> (i32, i32) {
    %c0_i32 = arith.constant 0 : i32
    %c0_i32_0 = arith.constant 0 : i32
    return %arg0, %c0_i32 : i32, i32
  }
  func.func @transform_1(%arg0: i32, %arg1: memref<1xi32, #tpu.memory_space<smem>>) -> (i32, i32) {
    %c0_i32 = arith.constant 0 : i32
    %c0_i32_0 = arith.constant 0 : i32
    return %arg0, %c0_i32 : i32, i32
  }
}

</mosaic_0001>

<bundles_post_ra>
// kernel: tpu_custom_call.1
= control target key start
LH: loop header
LB: loop body
LE: loop exit
PB: predicated region body
PF: predicated region fallthrough
CT: control target
= control target key end

     0   :  { %8 = vsyncpa [#allocation5], 0  ;;  %s3712_s0 = inlined_call_operand.<no memory space> [shape: s32[1], index: 0, kind: input, shape index: {}]   ;;  %s3713_s1 = inlined_call_operand.hbm [shape: f32[2,1024], index: 1, kind: input, shape index: {}]   ;;  %s3714_s2 = inlined_call_operand.hbm [shape: f32[2,1024], index: 2, kind: output, shape index: {}]  }
   0x1   :  { %9 = vsyncpa [#allocation6], 0  ;;  %s2397_s9 = smov [#allocation4]  }
   0x2   :  { %s16_s10 = sshll.u32 %s2397_s9, 4  ;;  %s17_s10 = int_to_ptr.vmem [resolvable:$true] %s16_s10 }
   0x3   :  { %s2361_s11 = scalar_lea.vmem %s17_s10, 256  ;;  %p2366_p1 = scmp.lt.s32.totalorder %s17_s10, %s17_s10 }
   0x4   :  { %p2362_p0 = scmp.ne.s32.totalorder %s17_s10, %s2361_s11  ;;  %p2367_p2 = scmp.lt.s32.totalorder %s2361_s11, %s2361_s11 }
   0x6   :  { %p2368_p3 = por %p2367_p2, %p2366_p1 }
   0x8   :  { %p2369_p4 = pnand %p2368_p3, %p2362_p0 }
   0xa   :  { %2372 = shalt.err (!%p2369_p4)
}
   0xb   :  { %19 = dma.hbm_to_vmem [thread:$0]  %s3713_s1, 256, %s17_s10, [#allocation5]  }
   0xc   :  { %2393 = dma.done.wait [#allocation5], 256  }
   0xd   :  { %2394 = vsyncadd [#allocation5], 4294967040  ;;  %v23_v0 = vlaneseq  ;;  %v54_v7 = vstv %s3712_s0  ;;  %s2405_s0 = smov [#allocation7]  }
   0xe   :  { %s2171_s1 = sshll.u32 %s2405_s0, 4  ;;  %s2172_s1 = int_to_ptr.vmem [resolvable:$true] %s2171_s1 }
   0xf   :  { %v2424_v1 = vshrl.u32 %v23_v0, 7  ;;  %v26_v2 = vand.u32 127, %v23_v0  ;;  %s2373_s16 = scalar_lea.vmem %s2172_s1, 256  ;;  %p2378_p6 = scmp.lt.s32.totalorder %s2172_s1, %s2172_s1 }
  0x10   :  { %p2374_p5 = scmp.ne.s32.totalorder %s2172_s1, %s2373_s16  ;;  %p2379_p7 = scmp.lt.s32.totalorder %s2373_s16, %s2373_s16 }
  0x11   :  { %3765 = vst [vmem:[#allocation10_spill] sm:$0xff] %v2424_v1  ;;  %v27_v3 = vadd.s32 128, %v26_v2  ;;  %v34_v4 = vmul.u32 1024, %v2424_v1  ;;  %v28_v14 = vadd.s32 256, %v26_v2  ;;  %v29_v25 = vadd.s32 384, %v26_v2 }
  0x12   :  { %v30_v26 = vadd.s32 512, %v26_v2  ;;  %v31_v30 = vadd.s32 640, %v26_v2  ;;  %v32_v31 = vadd.s32 768, %v26_v2  ;;  %v33_v32 = vadd.s32 896, %v26_v2  ;;  %p2380_p8 = por %p2379_p7, %p2378_p6 }
  0x13   :  { %v35_v5 = vadd.s32 %v34_v4, %v26_v2  ;;  %v36_v6 = vadd.s32 %v34_v4, %v27_v3  ;;  %v37_v18 = vadd.s32 %v34_v4, %v28_v14  ;;  %v38_v33 = vadd.s32 %v34_v4, %v29_v25 }
  0x14   :  { %v39_v34 = vadd.s32 %v34_v4, %v30_v26  ;;  %v40_v38 = vadd.s32 %v34_v4, %v31_v30  ;;  %v41_v39 = vadd.s32 %v34_v4, %v32_v31  ;;  %v42_v40 = vadd.s32 %v34_v4, %v33_v32  ;;  %p2381_p9 = pnand %p2380_p8, %p2374_p5 }
  0x15   :  { %v46_v8 = vmul.u32 2654435769, %v35_v5  ;;  %v47_v9 = vmul.u32 2654435769, %v36_v6 }
  0x16   :  { %v48_v22 = vmul.u32 2654435769, %v37_v18  ;;  %v49_v41 = vmul.u32 2654435769, %v38_v33 }
  0x17   :  { %v55_v10 = vadd.s32 %v54_v7, %v46_v8  ;;  %v56_v11 = vadd.s32 %v54_v7, %v47_v9  ;;  %v50_v42 = vmul.u32 2654435769, %v39_v34  ;;  %v51_v47 = vmul.u32 2654435769, %v40_v38 }
  0x18   :  { %v57_v27 = vadd.s32 %v54_v7, %v48_v22  ;;  %v52_v48 = vmul.u32 2654435769, %v41_v39  ;;  %v53_v49 = vmul.u32 2654435769, %v42_v40  ;;  %v58_v50 = vadd.s32 %v54_v7, %v49_v41 }
  0x19   :  { %v63_v12 = vshrl.u32 %v55_v10, 16  ;;  %v64_v13 = vshrl.u32 %v56_v11, 16  ;;  %v59_v51 = vadd.s32 %v54_v7, %v50_v42  ;;  %v60_v55 = vadd.s32 %v54_v7, %v51_v47 }
  0x1a   :  { %v65_v35 = vshrl.u32 %v57_v27, 16  ;;  %v61_v56 = vadd.s32 %v54_v7, %v52_v48  ;;  %v62_v57 = vadd.s32 %v54_v7, %v53_v49  ;;  %v66_v58 = vshrl.u32 %v58_v50, 16 }
  0x1b   :  { %v71_v15 = vxor.u32 %v63_v12, %v55_v10  ;;  %v72_v16 = vxor.u32 %v64_v13, %v56_v11  ;;  %v67_v59 = vshrl.u32 %v59_v51, 16  ;;  %v68_v0 = vshrl.u32 %v60_v55, 16 }
  0x1c   :  { %v73_v43 = vxor.u32 %v65_v35, %v57_v27  ;;  %v69_v2 = vshrl.u32 %v61_v56, 16  ;;  %v70_v3 = vshrl.u32 %v62_v57, 16  ;;  %v74_v4 = vxor.u32 %v66_v58, %v58_v50 }
  0x1d   :  { %v79_v17 = vmul.u32 2246822507, %v71_v15  ;;  %v80_v20 = vmul.u32 2246822507, %v72_v16  ;;  %v75_v6 = vxor.u32 %v67_v59, %v59_v51  ;;  %v76_v11 = vxor.u32 %v68_v0, %v60_v55 }
  0x1e   :  { %v81_v52 = vmul.u32 2246822507, %v73_v43  ;;  %v77_v12 = vxor.u32 %v69_v2, %v61_v56  ;;  %v78_v7 = vxor.u32 %v70_v3, %v62_v57  ;;  %v82_v13 = vmul.u32 2246822507, %v74_v4 }
  0x1f   :  { %v87_v19 = vshrl.u32 %v79_v17, 13  ;;  %v88_v23 = vshrl.u32 %v80_v20, 13  ;;  %v83_v15 = vmul.u32 2246822507, %v75_v6 }
  0x20   :  { %v89_v60 = vshrl.u32 %v81_v52, 13  ;;  %v90_v22 = vshrl.u32 %v82_v13, 13 }
  0x21   :  { %v95_v21 = vxor.u32 %v87_v19, %v79_v17  ;;  %v96_v28 = vxor.u32 %v88_v23, %v80_v20  ;;  %v84_v19 = vmul.u32 2246822507, %v76_v11  ;;  %v85_v20 = vmul.u32 2246822507, %v77_v12 }
  0x22   :  { %v97_v8 = vxor.u32 %v89_v60, %v81_v52  ;;  %v91_v23 = vshrl.u32 %v83_v15, 13  ;;  %v98_v31 = vxor.u32 %v90_v22, %v82_v13  ;;  %v3728_v12 = vmov 2475754826  }
  0x23   :  { %v103_v24 = vmul.u32 3266489909, %v95_v21  ;;  %v104_v36 = vmul.u32 3266489909, %v96_v28  ;;  %v92_v27 = vshrl.u32 %v84_v19, 13  ;;  %v93_v28 = vshrl.u32 %v85_v20, 13 }
  0x24   :  { %v105_v16 = vmul.u32 3266489909, %v97_v8  ;;  %v86_v21 = vmul.u32 2246822507, %v78_v7  ;;  %v99_v32 = vxor.u32 %v91_v23, %v83_v15  ;;  %v3720_v23 = vmov 2131351028  }
  0x25   :  { %v111_v29 = vshrl.u32 %v103_v24, 16  ;;  %v112_v44 = vshrl.u32 %v104_v36, 16  ;;  %v101_v38 = vxor.u32 %v93_v28, %v85_v20  ;;  %v106_v41 = vmul.u32 3266489909, %v98_v31 }
  0x26   :  { %v94_v30 = vshrl.u32 %v86_v21, 13  ;;  %v107_v42 = vmul.u32 3266489909, %v99_v32  ;;  %v3726_v32 = vmov 920167782  }
  0x27   :  { %v2430_v37 = vxor.u32 %v111_v29, %v103_v24  ;;  %v2434_v53 = vxor.u32 %v112_v44, %v104_v36  ;;  %v113_v24 = vshrl.u32 %v105_v16, 16  ;;  %v100_v36 = vxor.u32 %v92_v27, %v84_v19 }
  0x28   :  { %v102_v40 = vxor.u32 %v94_v30, %v86_v21  ;;  %v109_v47 = vmul.u32 3266489909, %v101_v38  ;;  %v114_v50 = vshrl.u32 %v106_v41, 16  ;;  %v115_v51 = vshrl.u32 %v107_v42, 16 }
  0x29   :  { %v127_v45 = vmul.u32 3266489909, %v2430_v37  ;;  %v135_v46 = vshrl.u32 %v2430_v37, 15  ;;  %v128_v61 = vmul.u32 3266489909, %v2434_v53  ;;  %v136_v62 = vshrl.u32 %v2434_v53, 15 }
  0x2a   :  { %v2441_v33 = vxor.u32 %v113_v24, %v105_v16  ;;  %v110_v49 = vmul.u32 3266489909, %v102_v40  ;;  %v117_v57 = vshrl.u32 %v109_v47, 16  ;;  %v2447_v59 = vxor.u32 %v114_v50, %v106_v41 }
  0x2b   :  { %v143_v54 = vxor.u32 %v135_v46, %v127_v45  ;;  %v144_v9 = vxor.u32 %v136_v62, %v128_v61  ;;  %v108_v46 = vmul.u32 3266489909, %v100_v36  ;;  %v2449_v60 = vxor.u32 %v115_v51, %v107_v42 }
  0x2c   :  { %v129_v43 = vmul.u32 3266489909, %v2441_v33  ;;  %v137_v44 = vshrl.u32 %v2441_v33, 15  ;;  %v118_v58 = vshrl.u32 %v110_v49, 16  ;;  %v2455_v3 = vxor.u32 %v117_v57, %v109_v47 }
  0x2d   :  { %v183_v63 = vshrl.u32 %v143_v54, 9  ;;  %v184_v17 = vshrl.u32 %v144_v9, 9  ;;  %v116_v56 = vshrl.u32 %v108_v46, 16  ;;  %v131_v6 = vmul.u32 3266489909, %v2449_v60 }
  0x2e   :  { %v145_v52 = vxor.u32 %v137_v44, %v129_v43  ;;  %v2457_v4 = vxor.u32 %v118_v58, %v110_v49  ;;  %v133_v15 = vmul.u32 3266489909, %v2455_v3  ;;  %v139_v21 = vshrl.u32 %v2449_v60, 15 }
  0x2f   :  { %v191_v5 = vcvt.s32.f32 %v183_v63  ;;  %v192_v26 = vcvt.s32.f32 %v184_v17  ;;  %v2453_v2 = vxor.u32 %v116_v56, %v108_v46  ;;  %v138_v17 = vshrl.u32 %v2447_v59, 15 }
  0x30   :  { %v185_v61 = vshrl.u32 %v145_v52, 9  ;;  %v134_v16 = vmul.u32 3266489909, %v2457_v4  ;;  %v3724_v36 = vmov 1326507024   ;;  %v151_v52 = vshrl.u32 %v2430_v37, 9 }
  0x31   :  { %v199_v10 = vadd.f32 1.0, %v191_v5  ;;  %v200_v35 = vadd.f32 1.0, %v192_v26  ;;  %v130_v5 = vmul.u32 3266489909, %v2447_v59  ;;  %v153_v57 = vshrl.u32 %v2441_v33, 9 }
  0x32   :  { %v193_v8 = vcvt.s32.f32 %v185_v61  ;;  %v154_v58 = vshrl.u32 %v2447_v59, 9 }
  0x33   :  { %v207_v14 = vmul.f32 1.1920929e-07, %v199_v10  ;;  %v208_v45 = vmul.f32 1.1920929e-07, %v200_v35  ;;  %v3730_v10 = vmov 683565275   ;;  %v146_v51 = vxor.u32 %v138_v17, %v130_v5 }
  0x34   :  { %v201_v22 = vadd.f32 1.0, %v193_v8  ;;  %v157_v17 = vshrl.u32 %v2455_v3, 9 }
  0x35   :  { %v2438_v18 = vmul.f32 6.2831855, %v207_v14  ;;  %v2445_v54 = vmul.f32 6.2831855, %v208_v45  ;;  %v132_v14 = vmul.u32 3266489909, %v2453_v2 }
  0x36   :  { %v209_v44 = vmul.f32 1.1920929e-07, %v201_v22  ;;  %v159_v22 = vcvt.s32.f32 %v151_v52 }
  0x37   :  { %v306_v25 = vand.u32 2139095040, %v2438_v18  ;;  %v3719_v62 = vand.u32 2147483647, %v2438_v18  ;;  %v409_v0 = vand.u32 2139095040, %v2445_v54 }
  0x38   :  { %v2505_v8 = vmul.f32 6.2831855, %v209_v44 }
  0x39   :  { %v307_v29 = vshrl.u32 %v306_v25, 23  ;;  %v310_v9 = vand.u32 8388607, %v3719_v62  ;;  %v410_v13 = vshrl.u32 %v409_v0, 23  ;;  %v3722_v25 = vmov 2102212464  }
  0x3b   :  { %v2180_v34 = vadd.s32 4294967169, %v307_v29  ;;  %v311_v27 = vor.u32 8388608, %v310_v9  ;;  %v2184_v30 = vadd.s32 4294967169, %v410_v13 }
  0x3d   :  { %v313_v39 = vadd.s32 1, %v2180_v34  ;;  %v416_v46 = vadd.s32 1, %v2184_v30  ;;  %v2493_v50 = vshll.u32 %v311_v27, 8  ;;  %v512_v30 = vand.u32 2139095040, %v2505_v8 }
  0x3f   :  { %vm314_vm0 = vcmp.gt.s32.totalorder %v313_v39, 0  ;;  %vm417_vm5 = vcmp.gt.s32.totalorder %v416_v46, 0 }
  0x40   :  { %v315_v48 = vsel %vm314_vm0, %v313_v39, 0  ;;  %v140_v39 = vshrl.u32 %v2453_v2, 15 }
  0x41   :  { %v317_v55 = vand.u32 31, %v315_v48  ;;  %v2469_v19 = vshrl.u32 %v315_v48, 5 }
  0x43   :  { %v318_v63 = vsub.s32 32, %v317_v55  ;;  %v320_v11 = vshll.u32 %v3730_v10, %v317_v55  ;;  %v323_v20 = vshll.u32 %v3728_v12, %v317_v55  ;;  %v326_v24 = vshll.u32 %v3720_v23, %v317_v55 }
  0x44   :  { %v329_v26 = vshll.u32 %v3722_v25, %v317_v55  ;;  %v332_v35 = vshll.u32 %v3726_v32, %v317_v55  ;;  %vm335_vm1 = vcmp.lt.s32.totalorder %v2469_v19, 1  ;;  %vm337_vm2 = vcmp.lt.s32.totalorder %v2469_v19, 3 }
  0x45   :  { %v321_v7 = vshrl.u32 %v3728_v12, %v318_v63  ;;  %v324_v29 = vshrl.u32 %v3720_v23, %v318_v63  ;;  %v327_v31 = vshrl.u32 %v3722_v25, %v318_v63  ;;  %v330_v34 = vshrl.u32 %v3726_v32, %v318_v63 }
  0x46   :  { %v333_v38 = vshrl.u32 %v3724_v36, %v318_v63  ;;  %vm338_vm3 = vcmp.lt.s32.totalorder %v2469_v19, 4  ;;  %vm336_vm4 = vcmp.lt.s32.totalorder %v2469_v19, 2  ;;  %v152_v55 = vshrl.u32 %v2434_v53, 9 }
  0x47   :  { %v322_v28 = vor.u32 %v321_v7, %v320_v11  ;;  %v325_v40 = vor.u32 %v324_v29, %v323_v20  ;;  %v328_v41 = vor.u32 %v327_v31, %v326_v24  ;;  %v331_v42 = vor.u32 %v330_v34, %v329_v26 }
  0x48   :  { %v334_v43 = vor.u32 %v333_v38, %v332_v35  ;;  %v319_v5 = vshrl.u32 %v3730_v10, %v318_v63  ;;  %v155_v53 = vshrl.u32 %v2449_v60, 9  ;;  %v141_v11 = vshrl.u32 %v2455_v3, 15 }
  0x49   :  { %v343_v45 = vsel %vm335_vm1, %v322_v28, %v325_v40  ;;  %v344_v47 = vsel %vm338_vm3, %v331_v42, 920167782  ;;  %v347_v48 = vsel %vm335_vm1, %v325_v40, %v328_v41  ;;  %v340_v33 = vsel %vm338_vm3, %v328_v41, 2102212464 }
  0x4a   :  { %v348_v49 = vsel %vm338_vm3, %v334_v43, 1326507024  ;;  %v345_v56 = vsel %vm337_vm2, %v328_v41, %v344_v47  ;;  %v156_v7 = vshrl.u32 %v2453_v2, 9  ;;  %v158_v20 = vshrl.u32 %v2457_v4, 9 }
  0x4b   :  { %v346_v61 = vsel %vm336_vm4, %v343_v45, %v345_v56  ;;  %v349_v0 = vsel %vm337_vm2, %v331_v42, %v348_v49  ;;  %v418_v24 = vsel %vm417_vm5, %v416_v46, 0  ;;  %v186_v26 = vshrl.u32 %v146_v51, 9 }
  0x4c   :  { %v350_v37 = vsel %vm336_vm4, %v347_v48, %v349_v0  ;;  %v2520_v13 = vmul.u32.u64.low %v2493_v50, %v346_v61  ;;  %v2521_v63 = vmul.u32.u64.high %v2493_v50, %v346_v61, %v2520_v13  ;;  %v339_v27 = vsel %vm335_vm1, %v319_v5, %v322_v28 }
  0x4d   :  { %v2514_v59 = vmul.u32.u64.low %v2493_v50, %v350_v37  ;;  %v2515_v9 = vmul.u32.u64.high %v2493_v50, %v350_v37, %v2514_v59  ;;  %v341_v29 = vsel %vm337_vm2, %v325_v40, %v340_v33  ;;  %v160_v31 = vcvt.s32.f32 %v152_v55 }
  0x4e   :  { %v161_v34 = vcvt.s32.f32 %v153_v57  ;;  %v162_v35 = vcvt.s32.f32 %v154_v58  ;;  %v163_v38 = vcvt.s32.f32 %v155_v53  ;;  %v142_v41 = vshrl.u32 %v2457_v4, 15 }
  0x4f   :  { %v2536_v42 = vxor.u32 %v139_v21, %v131_v6  ;;  %v164_v43 = vcvt.s32.f32 %v156_v7  ;;  %v420_v44 = vand.u32 31, %v418_v24  ;;  %v165_v28 = vcvt.s32.f32 %v157_v17 }
  0x50   :  { %v166_v45 = vcvt.s32.f32 %v158_v20  ;;  %v342_v40 = vsel %vm336_vm4, %v339_v27, %v341_v29  ;;  %v361_v46 = vadd.s32 1, %v2521_v63  ;;  %v167_v47 = vadd.f32 1.0, %v159_v22 }
  0x51   :  { %v194_v48 = vcvt.s32.f32 %v186_v26  ;;  %vm360_vm6 = vc.u32 %v2515_v9, %v2520_v13  ;;  %v513_v49 = vshrl.u32 %v512_v30, 23  ;;  %v168_v51 = vadd.f32 1.0, %v160_v31 }
  0x52   :  { %v169_v52 = vadd.f32 1.0, %v161_v34  ;;  %v170_v60 = vadd.f32 1.0, %v162_v35  ;;  %v171_v6 = vadd.f32 1.0, %v163_v38  ;;  %v148_v21 = vxor.u32 %v140_v39, %v132_v14 }
  0x53   :  { %v172_v55 = vadd.f32 1.0, %v164_v43  ;;  %v358_v19 = vmul.u32 %v2493_v50, %v342_v40  ;;  %v421_v56 = vsub.s32 32, %v420_v44  ;;  %v149_v57 = vxor.u32 %v141_v11, %v133_v15 }
  0x54   :  { %v150_v58 = vxor.u32 %v142_v41, %v134_v16  ;;  %v173_v61 = vadd.f32 1.0, %v165_v28  ;;  %v362_v0 = vsel %vm360_vm6, %v361_v46, %v2521_v63  ;;  %v174_v5 = vadd.f32 1.0, %v166_v45 }
  0x55   :  { %v175_v37 = vmul.f32 1.1920929e-07, %v167_v47  ;;  %v202_v53 = vadd.f32 1.0, %v194_v48  ;;  %v2188_v33 = vadd.s32 4294967169, %v513_v49  ;;  %v2553_v59 = vmul.f32 1.1920929e-07, %v168_v51 }
  0x56   :  { %v2555_v2 = vmul.f32 1.1920929e-07, %v169_v52  ;;  %v2557_v14 = vmul.f32 1.1920929e-07, %v170_v60  ;;  %v2559_v39 = vmul.f32 1.1920929e-07, %v171_v6  ;;  %v2561_v3 = vmul.f32 1.1920929e-07, %v172_v55 }
  0x57   :  { %v2563_v15 = vadd.s32 %v362_v0, %v358_v19  ;;  %v432_v4 = vshll.u32 %v3722_v25, %v420_v44  ;;  %v433_v16 = vshrl.u32 %v3726_v32, %v421_v56  ;;  %v3718_v50 = vand.u32 2147483647, %v2445_v54 }
  0x58   :  { %v2568_v11 = vshrl.u32 %v418_v24, 5  ;;  %v435_v7 = vshll.u32 %v3726_v32, %v420_v44  ;;  %v436_v63 = vshrl.u32 %v3724_v36, %v421_v56  ;;  %v210_v17 = vmul.f32 1.1920929e-07, %v202_v53 }
  0x59   :  { %v423_v20 = vshll.u32 %v3730_v10, %v420_v44  ;;  %v426_v22 = vshll.u32 %v3728_v12, %v420_v44  ;;  %v519_v26 = vadd.s32 1, %v2188_v33  ;;  %v424_v27 = vshrl.u32 %v3728_v12, %v421_v56 }
  0x5a   :  { %v427_v29 = vshrl.u32 %v3720_v23, %v421_v56  ;;  %v429_v30 = vshll.u32 %v3720_v23, %v420_v44  ;;  %v430_v31 = vshrl.u32 %v3722_v25, %v421_v56  ;;  %v2578_v24 = vmul.f32 1.1920929e-07, %v173_v61 }
  0x5b   :  { %v187_v34 = vshrl.u32 %v2536_v42, 9  ;;  %v364_v35 = vadd.s32 536870912, %v2563_v15  ;;  %v434_v38 = vor.u32 %v433_v16, %v432_v4  ;;  %v188_v41 = vshrl.u32 %v148_v21, 9 }
  0x5c   :  { %v413_v43 = vand.u32 8388607, %v3718_v50  ;;  %v437_v28 = vor.u32 %v436_v63, %v435_v7  ;;  %vm441_vm7 = vcmp.lt.s32.totalorder %v2568_v11, 4  ;;  %v189_v45 = vshrl.u32 %v149_v57, 9 }
  0x5d   :  { %v190_v40 = vshrl.u32 %v150_v58, 9  ;;  %v2585_v46 = vmul.f32 6.2831855, %v210_v17  ;;  %vm520_vm8 = vcmp.gt.s32.totalorder %v519_v26, 0  ;;  %v425_v44 = vor.u32 %v424_v27, %v423_v20 }
  0x5e   :  { %v428_v47 = vor.u32 %v427_v29, %v426_v22  ;;  %v431_v48 = vor.u32 %v430_v31, %v429_v30  ;;  %vm438_vm9 = vcmp.lt.s32.totalorder %v2568_v11, 1  ;;  %v2588_v42 = vshrl.u32 %v364_v35, 30 }
  0x5f   :  { %vm440_vm10 = vcmp.lt.s32.totalorder %v2568_v11, 3  ;;  %v447_v49 = vsel %vm441_vm7, %v434_v38, 920167782  ;;  %v521_v51 = vsel %vm520_vm8, %v519_v26, 0  ;;  %v2593_v52 = vmul.f32 1.1920929e-07, %v174_v5 }
  0x60   :  { %v195_v60 = vcvt.s32.f32 %v187_v34  ;;  %v414_v6 = vor.u32 8388608, %v413_v43  ;;  %v451_v21 = vsel %vm441_vm7, %v437_v28, 1326507024  ;;  %v196_v55 = vcvt.s32.f32 %v188_v41 }
  0x61   :  { %v197_v19 = vcvt.s32.f32 %v189_v45  ;;  %v523_v57 = vand.u32 31, %v521_v51  ;;  %v615_v58 = vand.u32 2139095040, %v2585_v46  ;;  %v198_v61 = vcvt.s32.f32 %v190_v40 }
  0x62   :  { %vm439_vm11 = vcmp.lt.s32.totalorder %v2568_v11, 2  ;;  %v446_v0 = vsel %vm438_vm9, %v425_v44, %v428_v47  ;;  %v448_v5 = vsel %vm440_vm10, %v431_v48, %v447_v49  ;;  %v366_v53 = vshll.u32 %v2588_v42, 30 }
  0x63   :  { %v422_v33 = vshrl.u32 %v3730_v10, %v421_v56  ;;  %v450_v4 = vsel %vm438_vm9, %v428_v47, %v431_v48  ;;  %v452_v16 = vsel %vm440_vm10, %v434_v38, %v451_v21  ;;  %2285 = vlog2.f32 %v175_v37 }
  0x64   :  { %v443_v7 = vsel %vm441_vm7, %v431_v48, 2102212464  ;;  %v2611_v63 = vshll.u32 %v414_v6, 8  ;;  %v2613_v17 = vsub.s32 32, %v523_v57  ;;  %v203_v20 = vadd.f32 1.0, %v195_v60 }
  0x65   :  { %v204_v22 = vadd.f32 1.0, %v196_v55  ;;  %v449_v26 = vsel %vm439_vm11, %v446_v0, %v448_v5  ;;  %v616_v56 = vshrl.u32 %v615_v58, 23  ;;  %v205_v27 = vadd.f32 1.0, %v197_v19 }
  0x66   :  { %v206_v29 = vadd.f32 1.0, %v198_v61  ;;  %2287 = vlog2.f32 %v2553_v59  ;;  %v453_v37 = vsel %vm439_vm11, %v450_v4, %v452_v16  ;;  %v2621_v30 = vsub.s32 %v2563_v15, %v366_v53 }
  0x67   :  { %v442_v31 = vsel %vm438_vm9, %v422_v33, %v425_v44  ;;  %v444_v34 = vsel %vm440_vm10, %v428_v47, %v443_v7  ;;  %v3716_v35 = vand.u32 2147483647, %v2505_v8  ;;  %v535_v59 = vshll.u32 %v3722_v25, %v523_v57 }
  0x68   :  { %v2629_v38 = vmul.u32.u64.low %v2611_v63, %v449_v26  ;;  %v2630_v41 = vmul.u32.u64.high %v2611_v63, %v449_v26, %v2629_v38  ;;  %v536_v43 = vshrl.u32 %v3726_v32, %v2613_v17  ;;  %v2640_v45 = vshrl.u32 %v521_v51, 5 }
  0x69   :  { %v2637_v15 = vmul.u32.u64.low %v2611_v63, %v453_v37  ;;  %v2638_v28 = vmul.u32.u64.high %v2611_v63, %v453_v37, %v2637_v15  ;;  %v2192_v40 = vadd.s32 4294967169, %v616_v56  ;;  %v526_v44 = vshll.u32 %v3730_v10, %v523_v57 }
  0x6a   :  { %v529_v47 = vshll.u32 %v3728_v12, %v523_v57  ;;  %v532_v48 = vshll.u32 %v3720_v23, %v523_v57  ;;  %v538_v49 = vshll.u32 %v3726_v32, %v523_v57  ;;  %v527_v60 = vshrl.u32 %v3728_v12, %v2613_v17 }
  0x6b   :  { %v530_v6 = vshrl.u32 %v3720_v23, %v2613_v17  ;;  %v533_v21 = vshrl.u32 %v3722_v25, %v2613_v17  ;;  %v539_v51 = vshrl.u32 %v3724_v36, %v2613_v17  ;;  %v211_v55 = vmul.f32 1.1920929e-07, %v203_v20 }
  0x6c   :  { %v212_v19 = vmul.f32 1.1920929e-07, %v204_v22  ;;  %v213_v58 = vmul.f32 1.1920929e-07, %v205_v27  ;;  %v537_v61 = vor.u32 %v536_v43, %v535_v59  ;;  %v214_v0 = vmul.f32 1.1920929e-07, %v206_v29 }
  0x6d   :  { %2289 = vlog2.f32 %v2555_v2  ;;  %v516_v57 = vand.u32 8388607, %v3716_v35  ;;  %vm544_vm12 = vcmp.lt.s32.totalorder %v2640_v45, 4  ;;  %v369_v5 = vsub.s32 0, %v2621_v30 }
  0x6e   :  { %2291 = vlog2.f32 %v2557_v14  ;;  %v445_v53 = vsel %vm439_vm11, %v442_v31, %v444_v34  ;;  %v622_v33 = vadd.s32 1, %v2192_v40  ;;  %v2662_v4 = vor.u32 %v527_v60, %v526_v44 }
  0x6f   :  { %v2664_v16 = vor.u32 %v530_v6, %v529_v47  ;;  %v534_v7 = vor.u32 %v533_v21, %v532_v48  ;;  %v540_v20 = vor.u32 %v539_v51, %v538_v49  ;;  %v464_v2 = vadd.s32 1, %v2630_v41 }
  0x70   :  { %vm541_vm13 = vcmp.lt.s32.totalorder %v2640_v45, 1  ;;  %vm543_vm14 = vcmp.lt.s32.totalorder %v2640_v45, 3  ;;  %v550_v14 = vsel %vm544_vm12, %v537_v61, 920167782  ;;  %v2286_v22 = vpop.eup %2285  ;;  %2293 = vlog2.f32 %v2559_v39 }
  0x71   :  { %v2672_v11 = vmul.f32 6.2831855, %v211_v55  ;;  %vm463_vm15 = vc.u32 %v2638_v28, %v2629_v38  ;;  %v517_v26 = vor.u32 8388608, %v516_v57  ;;  %v461_v56 = vmul.u32 %v2611_v63, %v445_v53 }
  0x72   :  { %vm542_vm0 = vcmp.lt.s32.totalorder %v2640_v45, 2  ;;  %v3715_v27 = vand.u32 2147483647, %v2585_v46  ;;  %vm623_vm1 = vcmp.gt.s32.totalorder %v622_v33, 0  ;;  %v549_v37 = vsel %vm541_vm13, %v2662_v4, %v2664_v16 }
  0x73   :  { %v2288_v29 = vpop.eup %2287  ;;  %v551_v39 = vsel %vm543_vm14, %v534_v7, %v550_v14  ;;  %v554_v31 = vsel %vm544_vm12, %v540_v20, 1326507024  ;;  %v624_v34 = vsel %vm623_vm1, %v622_v33, 0  ;;  %v216_v59 = vmul.f32 0.6931472, %v2286_v22 }
  0x74   :  { %v2181_v63 = vmin.u32 %v369_v5, %v2621_v30  ;;  %v465_v43 = vsel %vm463_vm15, %v464_v2, %v2630_v41  ;;  %v626_v15 = vand.u32 31, %v624_v34  ;;  %2295 = vlog2.f32 %v2561_v3 }
  0x75   :  { %v2690_v40 = vmul.f32 6.2831855, %v212_v19  ;;  %v2692_v44 = vmul.f32 6.2831855, %v213_v58  ;;  %v2694_v47 = vshll.u32 %v517_v26, 8  ;;  %2297 = vlog2.f32 %v2578_v24 }
  0x76   :  { %v552_v48 = vsel %vm542_vm0, %v549_v37, %v551_v39  ;;  %v553_v49 = vsel %vm541_vm13, %v2664_v16, %v534_v7  ;;  %v555_v41 = vsel %vm543_vm14, %v537_v61, %v554_v31  ;;  %2299 = vlog2.f32 %v2593_v52 }
  0x77   :  { %v2705_v3 = vmul.f32 6.2831855, %v214_v0  ;;  %v2707_v60 = vadd.s32 %v465_v43, %v461_v56  ;;  %v627_v6 = vsub.s32 32, %v626_v15  ;;  %v218_v21 = vmul.f32 0.6931472, %v2288_v29 }
  0x78   :  { %v2709_v51 = vmul.f32 -2.0, %v216_v59  ;;  %v371_v24 = vclz %v2181_v63  ;;  %v619_v55 = vand.u32 8388607, %v3715_v27  ;;  %v556_v19 = vsel %vm542_vm0, %v553_v49, %v555_v41 }
  0x79   :  { %v2716_v58 = vmul.u32.u64.low %v2694_v47, %v552_v48  ;;  %v2717_v61 = vmul.u32.u64.high %v2694_v47, %v552_v48, %v2716_v58  ;;  %v629_v52 = vshll.u32 %v3730_v10, %v626_v15  ;;  %v630_v57 = vshrl.u32 %v3728_v12, %v627_v6 }
  0x7a   :  { %v2290_v0 = vpop.eup %2289  ;;  %v632_v5 = vshll.u32 %v3728_v12, %v626_v15  ;;  %v633_v53 = vshrl.u32 %v3720_v23, %v627_v6  ;;  %v635_v33 = vshll.u32 %v3720_v23, %v626_v15  ;;  %v467_v2 = vadd.s32 536870912, %v2707_v60 }
  0x7b   :  { %v2292_v20 = vpop.eup %2291  ;;  %v625_v14 = vshrl.u32 %v624_v34, 5  ;;  %v636_v22 = vshrl.u32 %v3722_v25, %v627_v6  ;;  %v638_v26 = vshll.u32 %v3722_v25, %v626_v15  ;;  %v525_v56 = vshrl.u32 %v3730_v10, %v2613_v17 }
  0x7c   :  { %v2731_v29 = vmul.u32.u64.low %v2694_v47, %v556_v19  ;;  %v2732_v37 = vmul.u32.u64.high %v2694_v47, %v556_v19, %v2731_v29  ;;  %v639_v39 = vshrl.u32 %v3726_v32, %v627_v6  ;;  %v546_v31 = vsel %vm544_vm12, %v534_v7, 2102212464 }
  0x7d   :  { %v620_v59 = vor.u32 8388608, %v619_v55  ;;  %v641_v63 = vshll.u32 %v3726_v32, %v626_v15  ;;  %v642_v34 = vshrl.u32 %v3724_v36, %v627_v6  ;;  %v2294_v43 = vpop.eup %2293  ;;  %v631_v48 = vor.u32 %v630_v57, %v629_v52 }
  0x7e   :  { %v634_v49 = vor.u32 %v633_v53, %v632_v5  ;;  %v637_v41 = vor.u32 %v636_v22, %v635_v33  ;;  %v640_v27 = vor.u32 %v639_v39, %v638_v26  ;;  %v2182_v17 = vadd.s32 4294967294, %v371_v24 }
  0x7f   :  { %v2739_v35 = vshrl.u32 %v467_v2, 30  ;;  %vm644_vm2 = vcmp.lt.s32.totalorder %v625_v14, 1  ;;  %vm646_vm3 = vcmp.lt.s32.totalorder %v625_v14, 3  ;;  %v545_v19 = vsel %vm541_vm13, %v525_v56, %v2662_v4 }
  0x80   :  { %v547_v7 = vsel %vm543_vm14, %v2664_v16, %v546_v31  ;;  %v643_v15 = vor.u32 %v642_v34, %v641_v63  ;;  %vm647_vm4 = vcmp.lt.s32.totalorder %v625_v14, 4  ;;  %v220_v55 = vmul.f32 0.6931472, %v2290_v0 }
  0x81   :  { %v2747_v52 = vmul.f32 -2.0, %v218_v21  ;;  %2301 = vrsqrt.f32 %v2709_v51  ;;  %v653_v24 = vsel %vm647_vm4, %v640_v27, 920167782  ;;  %v2296_v57 = vpop.eup %2295  ;;  %v628_v5 = vshrl.u32 %v3730_v10, %v627_v6 }
  0x82   :  { %vm645_vm5 = vcmp.lt.s32.totalorder %v625_v14, 2  ;;  %v652_v53 = vsel %vm644_vm2, %v631_v48, %v634_v49  ;;  %v654_v4 = vsel %vm646_vm3, %v637_v41, %v653_v24  ;;  %v2298_v33 = vpop.eup %2297  ;;  %v548_v16 = vsel %vm542_vm0, %v545_v19, %v547_v7 }
  0x83   :  { %v567_v0 = vadd.s32 1, %v2717_v61  ;;  %v649_v21 = vsel %vm647_vm4, %v637_v41, 2102212464  ;;  %v660_v2 = vshll.u32 %v620_v59, 8  ;;  %v2300_v22 = vpop.eup %2299  ;;  %vm2183_vm6 = vcmp.lt.s32.totalorder %v2182_v17, 0 }
  0x84   :  { %v469_v26 = vshll.u32 %v2739_v35, 30  ;;  %vm566_vm7 = vc.u32 %v2732_v37, %v2716_v58  ;;  %v657_v6 = vsel %vm647_vm4, %v643_v15, 1326507024  ;;  %v222_v56 = vmul.f32 0.6931472, %v2292_v20 }
  0x85   :  { %v224_v29 = vmul.f32 0.6931472, %v2294_v43  ;;  %v655_v39 = vsel %vm645_vm5, %v652_v53, %v654_v4  ;;  %v656_v45 = vsel %vm644_vm2, %v634_v49, %v637_v41  ;;  %2303 = vrsqrt.f32 %v2747_v52 }
  0x86   :  { %v564_v31 = vmul.u32 %v2694_v47, %v548_v16  ;;  %v648_v59 = vsel %vm644_vm2, %v628_v5, %v631_v48  ;;  %v650_v63 = vsel %vm646_vm3, %v634_v49, %v649_v21  ;;  %v2768_v34 = vmul.f32 -2.0, %v220_v55 }
  0x87   :  { %v2770_v19 = vsel %vm2183_vm6, 0, %v2182_v17  ;;  %v568_v7 = vsel %vm566_vm7, %v567_v0, %v2717_v61  ;;  %v658_v20 = vsel %vm646_vm3, %v640_v27, %v657_v6  ;;  %v2775_v43 = vsub.s32 %v2707_v60, %v469_v26 }
  0x88   :  { %v659_v41 = vsel %vm645_vm5, %v656_v45, %v658_v20  ;;  %v2778_v15 = vmul.u32.u64.low %v660_v2, %v655_v39  ;;  %v2779_v24 = vmul.u32.u64.high %v660_v2, %v655_v39, %v2778_v15  ;;  %v226_v47 = vmul.f32 0.6931472, %v2296_v57 }
  0x89   :  { %v651_v48 = vsel %vm645_vm5, %v648_v59, %v650_v63  ;;  %v2783_v49 = vmul.u32.u64.low %v660_v2, %v659_v41  ;;  %v2784_v55 = vmul.u32.u64.high %v660_v2, %v659_v41, %v2783_v49  ;;  %vm241_vm8 = vcmp.eq.f32.partialorder %v2709_v51, inf }
  0x8a   :  { %v2787_v61 = vadd.s32 %v568_v7, %v564_v31  ;;  %v3717_v27 = vand.u32 2147483647, %v2672_v11  ;;  %v718_v60 = vand.u32 2139095040, %v2672_v11  ;;  %v228_v17 = vmul.f32 0.6931472, %v2298_v33 }
  0x8b   :  { %v2791_v5 = vmul.f32 -2.0, %v222_v56  ;;  %2305 = vrsqrt.f32 %v2768_v34  ;;  %v379_v57 = vsub.s32 4294967266, %v2770_v19  ;;  %v472_v14 = vsub.s32 0, %v2775_v43 }
  0x8c   :  { %v667_v53 = vmul.u32 %v660_v2, %v651_v48  ;;  %v670_v4 = vadd.s32 1, %v2779_v24  ;;  %v719_v16 = vshrl.u32 %v718_v60, 23  ;;  %v230_v0 = vmul.f32 0.6931472, %v2300_v22 }
  0x8d   :  { %v2797_v21 = vmul.f32 -2.0, %v224_v29  ;;  %v2799_v26 = vmul.f32 -2.0, %v226_v47  ;;  %vm243_vm9 = vcmp.eq.f32.partialorder %v2709_v51, 0.0  ;;  %v244_v33 = vand.u32 2147483648, %v2709_v51 }
  0x8e   :  { %v2302_v6 = vpop.eup %2301  ;;  %v570_v39 = vadd.s32 536870912, %v2787_v61  ;;  %vm669_vm10 = vc.u32 %v2784_v55, %v2778_v15  ;;  %v2196_v2 = vadd.s32 4294967169, %v719_v16  ;;  %v2807_v45 = vmul.f32 -2.0, %v228_v17 }
  0x8f   :  { %3766 = vst [vmem:[#allocation11_spill] sm:$0xff] %v2799_v26  ;;  %vm248_vm11 = vcmp.eq.f32.partialorder %v2747_v52, inf  ;;  %v359_v22 = vadd.s32 %v2520_v13, %v2515_v9  ;;  %v375_v29 = vsub.s32 32, %v2770_v19  ;;  %v671_v31 = vsel %vm669_vm10, %v670_v4, %v2779_v24 }
  0x90   :  { %3767 = vst [vmem:[#allocation12_spill] sm:$0xff] %v2807_v45  ;;  %v380_v59 = vadd.s32 127, %v379_v57  ;;  %v2185_v63 = vmin.u32 %v472_v14, %v2775_v43  ;;  %v672_v7 = vadd.s32 %v671_v31, %v667_v53  ;;  %v725_v20 = vadd.s32 1, %v2196_v2 }
  0x91   :  { %v2815_v41 = vmul.f32 -2.0, %v230_v0  ;;  %v240_v47 = vmul.f32 %v2302_v6, %v2709_v51  ;;  %2307 = vrsqrt.f32 %v2791_v5  ;;  %v821_v48 = vand.u32 2139095040, %v2690_v40 }
  0x92   :  { %2309 = vrsqrt.f32 %v2797_v21  ;;  %v2821_v9 = vshrl.u32 %v570_v39, 30  ;;  %v673_v13 = vadd.s32 536870912, %v672_v7  ;;  %vm726_vm12 = vcmp.gt.s32.totalorder %v725_v20, 0  ;;  %v2304_v24 = vpop.eup %2303 }
  0x93   :  { %3768 = vst [vmem:[#allocation13_spill] sm:$0xff] %v2815_v41  ;;  %2311 = vrsqrt.f32 %v2799_v26  ;;  %v376_v49 = vshll.u32 %v2621_v30, %v2770_v19  ;;  %v377_v60 = vshrl.u32 %v359_v22, %v375_v29  ;;  %v727_v17 = vsel %vm726_vm12, %v725_v20, 0 }
  0x94   :  { %v381_v57 = vshll.u32 %v380_v59, 23  ;;  %v474_v14 = vclz %v2185_v63  ;;  %v2826_v53 = vshrl.u32 %v673_v13, 30  ;;  %v729_v4 = vand.u32 31, %v727_v17 }
  0x95   :  { %v242_v16 = vsel %vm241_vm8, %v2709_v51, %v240_v47  ;;  %2313 = vrsqrt.f32 %v2807_v45  ;;  %v822_v6 = vshrl.u32 %v821_v48, 23  ;;  %v247_v39 = vmul.f32 %v2304_v24, %v2747_v52 }
  0x96   :  { %v572_v30 = vshll.u32 %v2821_v9, 30  ;;  %v722_v19 = vand.u32 8388607, %v3717_v27  ;;  %v730_v2 = vsub.s32 32, %v729_v4  ;;  %2315 = vrsqrt.f32 %v2815_v41 }
  0x97   :  { %v675_v31 = vshll.u32 %v2826_v53, 30  ;;  %v2843_v63 = vsel %vm243_vm9, %v244_v33, %v242_v16  ;;  %v378_v20 = vor.u32 %v377_v60, %v376_v49  ;;  %v382_v47 = vor.u32 4788187, %v381_v57 }
  0x98   :  { %v2306_v59 = vpop.eup %2305  ;;  %3769 = vst [vmem:[#allocation14_spill] sm:$0xff] %v2843_v63  ;;  %v2186_v48 = vadd.s32 4294967294, %v474_v14  ;;  %v732_v13 = vshll.u32 %v3730_v10, %v729_v4  ;;  %v733_v24 = vshrl.u32 %v3728_v12, %v730_v2  ;;  %v735_v22 = vshll.u32 %v3728_v12, %v729_v4 }
  0x99   :  { %v2200_v0 = vadd.s32 4294967169, %v822_v6  ;;  %v249_v29 = vsel %vm248_vm11, %v2747_v52, %v247_v39  ;;  %v2852_v27 = vsub.s32 %v2787_v61, %v572_v30  ;;  %v723_v51 = vor.u32 8388608, %v722_v19 }
  0x9a   :  { %v736_v33 = vshrl.u32 %v3720_v23, %v730_v2  ;;  %v2855_v49 = vsub.s32 %v672_v7, %v675_v31  ;;  %v728_v60 = vshrl.u32 %v727_v17, 5  ;;  %v738_v57 = vshll.u32 %v3720_v23, %v729_v4 }
  0x9b   :  { %v739_v14 = vshrl.u32 %v3722_v25, %v730_v2  ;;  %v2860_v16 = vmul.f32 %v2306_v59, %v2768_v34  ;;  %v383_v6 = vand.u32 2147483647, %v382_v47  ;;  %v385_v50 = vcvt.s32.f32 %v378_v20 }
  0x9c   :  { %v741_v39 = vshll.u32 %v3722_v25, %v729_v4  ;;  %vm250_vm13 = vcmp.eq.f32.partialorder %v2747_v52, 0.0  ;;  %vm2187_vm14 = vcmp.lt.s32.totalorder %v2186_v48, 0  ;;  %v734_v61 = vor.u32 %v733_v24, %v732_v13 }
  0x9d   :  { %v737_v30 = vor.u32 %v736_v33, %v735_v22  ;;  %v828_v19 = vadd.s32 1, %v2200_v0  ;;  %v575_v17 = vsub.s32 0, %v2852_v27  ;;  %v742_v31 = vshrl.u32 %v3726_v32, %v730_v2 }
  0x9e   :  { %v2864_v7 = vpop.eup %2307  ;;  %v744_v62 = vshll.u32 %v3726_v32, %v729_v4  ;;  %v2869_v59 = vshll.u32 %v723_v51, 8  ;;  %v678_v20 = vsub.s32 0, %v2855_v49  ;;  %v740_v23 = vor.u32 %v739_v14, %v738_v57 }
  0x9f   :  { %v2871_v47 = vpop.eup %2309  ;;  %v745_v25 = vshrl.u32 %v3724_v36, %v730_v2  ;;  %vm747_vm15 = vcmp.lt.s32.totalorder %v728_v60, 1  ;;  %v731_v0 = vshrl.u32 %v3730_v10, %v730_v2  ;;  %v743_v13 = vor.u32 %v742_v31, %v741_v39 }
  0xa0   :  { %v2875_v22 = vpop.eup %2311  ;;  %vm749_vm0 = vcmp.lt.s32.totalorder %v728_v60, 3  ;;  %vm750_vm1 = vcmp.lt.s32.totalorder %v728_v60, 4  ;;  %vm748_vm2 = vcmp.lt.s32.totalorder %v728_v60, 2  ;;  %v755_v4 = vsel %vm747_vm15, %v734_v61, %v737_v30 }
  0xa1   :  { %3770 = vst [vmem:[#allocation15_spill] sm:$0xff] %v2875_v22  ;;  %v746_v24 = vor.u32 %v745_v25, %v744_v62  ;;  %vm829_vm3 = vcmp.gt.s32.totalorder %v828_v19, 0  ;;  %v2882_v33 = vsel %vm2187_vm14, 0, %v2186_v48  ;;  %v2189_v57 = vmin.u32 %v575_v17, %v2852_v27 }
  0xa2   :  { %v2879_v51 = vpop.eup %2313  ;;  %v752_v14 = vsel %vm750_vm1, %v740_v23, 2102212464  ;;  %v756_v36 = vsel %vm750_vm1, %v743_v13, 920167782  ;;  %v2193_v32 = vmin.u32 %v678_v20, %v2855_v49  ;;  %v759_v39 = vsel %vm747_vm15, %v737_v30, %v740_v23 }
  0xa3   :  { %3771 = vst [vmem:[#allocation16_spill] sm:$0xff] %v2879_v51  ;;  %v757_v2 = vsel %vm749_vm0, %v740_v23, %v756_v36  ;;  %v760_v62 = vsel %vm750_vm1, %v746_v24, 1326507024  ;;  %v2888_v25 = vpop.eup %2315  ;;  %v2890_v31 = vmul.f32 %v385_v50, %v383_v6  ;;  %v751_v12 = vsel %vm747_vm15, %v731_v0, %v734_v61 }
  0xa4   :  { %3772 = vst [vmem:[#allocation17_spill] sm:$0xff] %v2888_v25  ;;  %v758_v48 = vsel %vm748_vm2, %v755_v4, %v757_v2  ;;  %v830_v10 = vsel %vm829_vm3, %v828_v19, 0  ;;  %v753_v17 = vsel %vm749_vm0, %v737_v30, %v752_v14  ;;  %v761_v56 = vsel %vm749_vm0, %v743_v13, %v760_v62 }
  0xa5   :  { %v2897_v20 = vmul.u32.u64.low %v2869_v59, %v758_v48  ;;  %v2898_v1 = vmul.u32.u64.high %v2869_v59, %v758_v48, %v2897_v20  ;;  %v482_v23 = vsub.s32 4294967266, %v2882_v33  ;;  %v577_v36 = vclz %v2189_v57 }
  0xa6   :  { %v762_v50 = vsel %vm748_vm2, %v759_v39, %v761_v56  ;;  %v3733_v6 = vand.u32 2147483647, %v2690_v40  ;;  %v680_v61 = vclz %v2193_v32  ;;  %v832_v30 = vand.u32 31, %v830_v10 }
  0xa7   :  { %v2905_v0 = vmul.u32.u64.low %v2869_v59, %v762_v50  ;;  %v2906_v19 = vmul.u32.u64.high %v2869_v59, %v762_v50, %v2905_v0  ;;  %v3773_v13 = vand.u32 2147483648, %v2747_v52  ;;  %v462_v57 = vadd.s32 %v2629_v38, %v2638_v28 }
  0xa8   :  { %v754_v56 = vsel %vm748_vm2, %v751_v12, %v753_v17  ;;  %v478_v14 = vsub.s32 32, %v2882_v33  ;;  %v773_v2 = vadd.s32 1, %v2898_v1  ;;  %v833_v39 = vsub.s32 32, %v832_v30 }
  0xa9   :  { %v2912_v24 = vsel %vm250_vm13, %v3773_v13, %v249_v29  ;;  %v479_v62 = vshll.u32 %v2775_v43, %v2882_v33  ;;  %v483_v52 = vadd.s32 127, %v482_v23  ;;  %v2190_v29 = vadd.s32 4294967294, %v577_v36 }
  0xaa   :  { %3774 = vst [vmem:[#allocation18_spill] sm:$0xff] %v2912_v24  ;;  %v825_v48 = vand.u32 8388607, %v3733_v6  ;;  %v2194_v50 = vadd.s32 4294967294, %v680_v61  ;;  %v770_v38 = vmul.u32 %v2869_v59, %v754_v56  ;;  %vm772_vm4 = vc.u32 %v2906_v19, %v2897_v20 }
  0xab   :  { %v3775_v12 = vmov 683565275   ;;  %v774_v60 = vsel %vm772_vm4, %v773_v2, %v2898_v1  ;;  %v3776_v17 = vmov 2475754826   ;;  %v3777_v43 = vmov 2102212464  }
  0xac   :  { %v835_v28 = vshll.u32 %v3775_v12, %v832_v30  ;;  %v836_v0 = vshrl.u32 %v3776_v17, %v833_v39  ;;  %v838_v13 = vshll.u32 %v3776_v17, %v832_v30  ;;  %v844_v33 = vshll.u32 %v3777_v43, %v832_v30 }
  0xad   :  { %v831_v23 = vshrl.u32 %v830_v10, 5  ;;  %v3778_v36 = vmov 2131351028   ;;  %v842_v59 = vshrl.u32 %v3777_v43, %v833_v39  ;;  %v480_v56 = vshrl.u32 %v462_v57, %v478_v14 }
  0xae   :  { %v839_v32 = vshrl.u32 %v3778_v36, %v833_v39  ;;  %v841_v61 = vshll.u32 %v3778_v36, %v832_v30  ;;  %v484_v6 = vshll.u32 %v483_v52, 23  ;;  %v2938_v4 = vadd.s32 %v2716_v58, %v2732_v37 }
  0xaf   :  { %v3779_v1 = vmov 920167782   ;;  %vm2191_vm5 = vcmp.lt.s32.totalorder %v2190_v29, 0  ;;  %vm2195_vm6 = vcmp.lt.s32.totalorder %v2194_v50, 0  ;;  %v2941_v25 = vadd.s32 %v774_v60, %v770_v38 }
  0xb0   :  { %v845_v2 = vshrl.u32 %v3779_v1, %v833_v39  ;;  %v826_v41 = vor.u32 8388608, %v825_v48  ;;  %v837_v10 = vor.u32 %v836_v0, %v835_v28  ;;  %v840_v51 = vor.u32 %v839_v32, %v838_v13 }
  0xb1   :  { %v847_v45 = vshll.u32 %v3779_v1, %v832_v30  ;;  %vm305_vm7 = vcmp.lt.s32.totalorder %v2438_v18, 0  ;;  %v843_v57 = vor.u32 %v842_v59, %v841_v61  ;;  %v3780_v14 = vmov 1326507024  }
  0xb2   :  { %v846_v22 = vor.u32 %v845_v2, %v844_v33  ;;  %v848_v52 = vshrl.u32 %v3780_v14, %v833_v39  ;;  %vm850_vm8 = vcmp.lt.s32.totalorder %v831_v23, 1  ;;  %vm853_vm9 = vcmp.lt.s32.totalorder %v831_v23, 4 }
  0xb3   :  { %v481_v58 = vor.u32 %v480_v56, %v479_v62  ;;  %v2946_v37 = vsel %vm2191_vm5, 0, %v2190_v29  ;;  %v2948_v24 = vsel %vm2195_vm6, 0, %v2194_v50  ;;  %v834_v38 = vshrl.u32 %v3775_v12, %v833_v39 }
  0xb4   :  { %v776_v48 = vadd.s32 536870912, %v2941_v25  ;;  %v849_v32 = vor.u32 %v848_v52, %v847_v45  ;;  %vm852_vm10 = vcmp.lt.s32.totalorder %v831_v23, 3  ;;  %v855_v30 = vsel %vm853_vm9, %v843_v57, 2102212464 }
  0xb5   :  { %vm851_vm11 = vcmp.lt.s32.totalorder %v831_v23, 2  ;;  %v858_v28 = vsel %vm850_vm8, %v837_v10, %v840_v51  ;;  %v859_v60 = vsel %vm853_vm9, %v846_v22, 920167782  ;;  %v866_v0 = vshll.u32 %v826_v41, 8 }
  0xb6   :  { %v485_v13 = vor.u32 4788187, %v484_v6  ;;  %v585_v62 = vsub.s32 4294967266, %v2946_v37  ;;  %v688_v29 = vsub.s32 4294967266, %v2948_v24  ;;  %v862_v50 = vsel %vm850_vm8, %v840_v51, %v843_v57 }
  0xb7   :  { %v3781_v39 = vand.u32 2147483647, %v2438_v18  ;;  %v854_v33 = vsel %vm850_vm8, %v834_v38, %v837_v10  ;;  %v856_v61 = vsel %vm852_vm10, %v840_v51, %v855_v30  ;;  %v860_v59 = vsel %vm852_vm10, %v843_v57, %v859_v60 }
  0xb8   :  { %v863_v41 = vsel %vm853_vm9, %v849_v32, 1326507024  ;;  %v581_v6 = vsub.s32 32, %v2946_v37  ;;  %v2969_v56 = vshrl.u32 %v776_v48, 30  ;;  %v861_v2 = vsel %vm851_vm11, %v858_v28, %v860_v59 }
  0xb9   :  { %vm2960_vm12 = vcmp.le.f32.partialorder %v3781_v39, 0.7853982  ;;  %v864_v52 = vsel %vm852_vm10, %v846_v22, %v863_v41  ;;  %vm255_vm13 = vcmp.eq.f32.partialorder %v2768_v34, inf  ;;  %v924_v51 = vand.u32 2139095040, %v2692_v44 }
  0xba   :  { %v865_v39 = vsel %vm851_vm11, %v862_v50, %v864_v52  ;;  %v2975_v63 = vmul.u32.u64.low %v866_v0, %v861_v2  ;;  %v2976_v10 = vmul.u32.u64.high %v866_v0, %v861_v2, %v2975_v63  ;;  %v586_v57 = vadd.s32 127, %v585_v62 }
  0xbb   :  { %v668_v38 = vadd.s32 %v2778_v15, %v2784_v55  ;;  %v684_v48 = vsub.s32 32, %v2948_v24  ;;  %v857_v32 = vsel %vm851_vm11, %v854_v33, %v856_v61  ;;  %v689_v30 = vadd.s32 127, %v688_v29 }
  0xbc   :  { %v2984_v22 = vmul.u32.u64.low %v866_v0, %v865_v39  ;;  %v2985_v28 = vmul.u32.u64.high %v866_v0, %v865_v39, %v2984_v22  ;;  %v925_v60 = vshrl.u32 %v924_v51, 23  ;;  %v3784_v50 = vsub.s32 4, %v2588_v42 }
  0xbd   :  { %v486_v41 = vand.u32 2147483647, %v485_v13  ;;  %v488_v62 = vcvt.s32.f32 %v481_v58  ;;  %v778_v2 = vshll.u32 %v2969_v56, 30  ;;  %v3785_v15 = vxor.u32 2147483648, %v2890_v31 }
  0xbe   :  { %v390_v59 = vsel %vm305_vm7, %v3784_v50, %v2588_v42  ;;  %vm408_vm14 = vcmp.lt.s32.totalorder %v2445_v54, 0  ;;  %v873_v23 = vmul.u32 %v866_v0, %v857_v32  ;;  %v876_v29 = vadd.s32 1, %v2976_v10 }
  0xbf   :  { %v388_v55 = vsel %vm305_vm7, %v3785_v15, %v2890_v31  ;;  %v2204_v33 = vadd.s32 4294967169, %v925_v60  ;;  %v582_v61 = vshll.u32 %v2852_v27, %v2946_v37  ;;  %v583_v42 = vshrl.u32 %v2938_v4, %v581_v6 }
  0xc0   :  { %v587_v58 = vshll.u32 %v586_v57, 23  ;;  %v685_v13 = vshll.u32 %v2855_v49, %v2948_v24  ;;  %v686_v52 = vshrl.u32 %v668_v38, %v684_v48  ;;  %v690_v39 = vshll.u32 %v689_v30, 23 }
  0xc1   :  { %vm875_vm15 = vc.u32 %v2985_v28, %v2975_v63  ;;  %v931_v31 = vadd.s32 1, %v2204_v33  ;;  %v3009_v0 = vmul.f32 %v2864_v7, %v2791_v5  ;;  %v489_v51 = vmul.f32 %v488_v62, %v486_v41 }
  0xc2   :  { %v3012_v32 = vsub.s32 %v2941_v25, %v778_v2  ;;  %v877_v27 = vsel %vm875_vm15, %v876_v29, %v2976_v10  ;;  %v3017_v4 = vsel %vm2960_vm12, 0, %v390_v59  ;;  %v492_v49 = vsub.s32 4, %v2739_v35 }
  0xc3   :  { %3786 = vst [vmem:[#allocation19_spill] sm:$0xff] %v3017_v4  ;;  %v878_v24 = vadd.s32 %v877_v27, %v873_v23  ;;  %vm932_vm0 = vcmp.gt.s32.totalorder %v931_v31, 0  ;;  %v391_v37 = vsel %vm2960_vm12, %v2438_v18, %v388_v55  ;;  %v584_v7 = vor.u32 %v583_v42, %v582_v61 }
  0xc4   :  { %v588_v6 = vor.u32 4788187, %v587_v58  ;;  %v933_v57 = vsel %vm932_vm0, %v931_v31, 0  ;;  %v687_v38 = vor.u32 %v686_v52, %v685_v13  ;;  %v691_v25 = vor.u32 4788187, %v690_v39 }
  0xc5   :  { %v879_v48 = vadd.s32 536870912, %v878_v24  ;;  %v935_v30 = vand.u32 31, %v933_v57  ;;  %v3027_v10 = vsel %vm255_vm13, %v2768_v34, %v2860_v16  ;;  %v490_v22 = vxor.u32 2147483648, %v489_v51 }
  0xc6   :  { %3787 = vst [vmem:[#allocation20_spill] sm:$0xff] %v3027_v10  ;;  %v781_v60 = vsub.s32 0, %v3012_v32  ;;  %v3740_v50 = vand.u32 2147483647, %v2692_v44  ;;  %v3033_v45 = vmul.f32 %v2871_v47, %v2797_v21  ;;  %v3036_v59 = vand.u32 3, %v3017_v4 }
  0xc7   :  { %v3038_v41 = vshrl.u32 %v879_v48, 30  ;;  %v936_v62 = vsub.s32 32, %v935_v30  ;;  %2317 = vcosq.f32 %v391_v37  ;;  %v3043_v16 = vsel %vm408_vm14, %v492_v49, %v2739_v35 }
  0xc8   :  { %3788 = vst [vmem:[#allocation21_spill] sm:$0xff] %v3033_v45  ;;  %v589_v2 = vand.u32 2147483647, %v588_v6  ;;  %v591_v15 = vcvt.s32.f32 %v584_v7  ;;  %2319 = vsinq.f32 %v391_v37  ;;  %v692_v55 = vand.u32 2147483647, %v691_v25 }
  0xc9   :  { %3789 = vst [vmem:[#allocation22_spill] sm:$0xff] %v3038_v41  ;;  %v694_v23 = vcvt.s32.f32 %v687_v38  ;;  %v881_v47 = vshll.u32 %v3038_v41, 30  ;;  %v3790_v29 = vand.u32 2147483647, %v2445_v54  ;;  %v491_v61 = vsel %vm408_vm14, %v490_v22, %v489_v51 }
  0xca   :  { %v2197_v42 = vmin.u32 %v781_v60, %v3012_v32  ;;  %v928_v35 = vand.u32 8388607, %v3740_v50  ;;  %v938_v58 = vshll.u32 %v3775_v12, %v935_v30  ;;  %vm511_vm2 = vcmp.lt.s32.totalorder %v2505_v8, 0 }
  0xcb   :  { %vm3048_vm1 = vcmp.le.f32.partialorder %v3790_v29, 0.7853982  ;;  %v3059_v13 = vsub.s32 %v878_v24, %v881_v47  ;;  %v939_v52 = vshrl.u32 %v3776_v17, %v936_v62  ;;  %v941_v39 = vshll.u32 %v3776_v17, %v935_v30 }
  0xcc   :  { %v942_v31 = vshrl.u32 %v3778_v36, %v936_v62  ;;  %v592_v27 = vmul.f32 %v591_v15, %v589_v2  ;;  %vm614_vm3 = vcmp.lt.s32.totalorder %v2585_v46, 0  ;;  %v934_v51 = vshrl.u32 %v933_v57, 5 }
  0xcd   :  { %v944_v49 = vshll.u32 %v3778_v36, %v935_v30  ;;  %v945_v37 = vshrl.u32 %v3777_v43, %v936_v62  ;;  %v695_v7 = vmul.f32 %v694_v23, %v692_v55  ;;  %v884_v6 = vsub.s32 0, %v3059_v13 }
  0xce   :  { %v947_v24 = vshll.u32 %v3777_v43, %v935_v30  ;;  %v1027_v38 = vand.u32 2139095040, %v2705_v3  ;;  %v783_v25 = vclz %v2197_v42  ;;  %v929_v48 = vor.u32 8388608, %v928_v35 }
  0xcf   :  { %v948_v22 = vshrl.u32 %v3779_v1, %v936_v62  ;;  %v950_v60 = vshll.u32 %v3779_v1, %v935_v30  ;;  %v3793_v2 = vand.u32 2147483647, %v2505_v8  ;;  %v3796_v15 = vand.u32 2147483647, %v2585_v46 }
  0xd0   :  { %v2201_v23 = vmin.u32 %v884_v6, %v3059_v13  ;;  %v937_v47 = vshrl.u32 %v3775_v12, %v936_v62  ;;  %v940_v29 = vor.u32 %v939_v52, %v938_v58  ;;  %v943_v42 = vor.u32 %v942_v31, %v941_v39 }
  0xd1   :  { %vm3074_vm4 = vcmp.le.f32.partialorder %v3793_v2, 0.7853982  ;;  %vm3080_vm5 = vcmp.le.f32.partialorder %v3796_v15, 0.7853982  ;;  %v946_v35 = vor.u32 %v945_v37, %v944_v49  ;;  %v949_v30 = vor.u32 %v948_v22, %v947_v24 }
  0xd2   :  { %v951_v50 = vshrl.u32 %v3780_v14, %v936_v62  ;;  %vm953_vm6 = vcmp.lt.s32.totalorder %v934_v51, 1  ;;  %v593_v2 = vxor.u32 2147483648, %v592_v27  ;;  %v696_v4 = vxor.u32 2147483648, %v695_v7 }
  0xd3   :  { %vm956_vm7 = vcmp.lt.s32.totalorder %v934_v51, 4  ;;  %v1028_v45 = vshrl.u32 %v1027_v38, 23  ;;  %v2198_v10 = vadd.s32 4294967294, %v783_v25  ;;  %vm955_vm8 = vcmp.lt.s32.totalorder %v934_v51, 3 }
  0xd4   :  { %v952_v15 = vor.u32 %v951_v50, %v950_v60  ;;  %v958_v41 = vsel %vm956_vm7, %v946_v35, 2102212464  ;;  %v886_v26 = vclz %v2201_v23  ;;  %vm954_vm9 = vcmp.lt.s32.totalorder %v934_v51, 2  ;;  %v3093_v49 = vpop.eup %2317 }
  0xd5   :  { %v961_v6 = vsel %vm953_vm6, %v940_v29, %v943_v42  ;;  %v969_v58 = vshll.u32 %v929_v48, 8  ;;  %v957_v52 = vsel %vm953_vm6, %v937_v47, %v940_v29  ;;  %v959_v39 = vsel %vm955_vm8, %v943_v42, %v958_v41  ;;  %v3100_v25 = vpop.eup %2319 }
  0xd6   :  { %v962_v62 = vsel %vm956_vm7, %v949_v30, 920167782  ;;  %v965_v31 = vsel %vm953_vm6, %v943_v42, %v946_v35  ;;  %v494_v50 = vsel %vm3048_vm1, %v2445_v54, %v491_v61  ;;  %v966_v24 = vsel %vm956_vm7, %v952_v15, 1326507024 }
  0xd7   :  { %v963_v37 = vsel %vm955_vm8, %v946_v35, %v962_v62  ;;  %v2208_v38 = vadd.s32 4294967169, %v1028_v45  ;;  %v594_v41 = vsel %vm511_vm2, %v593_v2, %v592_v27  ;;  %vm2199_vm10 = vcmp.lt.s32.totalorder %v2198_v10, 0 }
  0xd8   :  { %v964_v48 = vsel %vm954_vm9, %v961_v6, %v963_v37  ;;  %v967_v22 = vsel %vm955_vm8, %v949_v30, %v966_v24  ;;  %v697_v60 = vsel %vm614_vm3, %v696_v4, %v695_v7  ;;  %v2202_v23 = vadd.s32 4294967294, %v886_v26 }
  0xd9   :  { %v960_v61 = vsel %vm954_vm9, %v957_v52, %v959_v39  ;;  %v968_v47 = vsel %vm954_vm9, %v965_v31, %v967_v22  ;;  %v3113_v42 = vmul.u32.u64.low %v969_v58, %v964_v48  ;;  %v3114_v35 = vmul.u32.u64.high %v969_v58, %v964_v48, %v3113_v42 }
  0xda   :  { %v3110_v29 = vmul.u32.u64.low %v969_v58, %v968_v47  ;;  %v3111_v45 = vmul.u32.u64.high %v969_v58, %v968_v47, %v3110_v29  ;;  %2321 = vcosq.f32 %v494_v50  ;;  %v595_v27 = vsub.s32 4, %v2821_v9 }
  0xdb   :  { %v3118_v2 = vsel %vm2199_vm10, 0, %v2198_v10  ;;  %v1034_v30 = vadd.s32 1, %v2208_v38  ;;  %v3123_v26 = vsel %vm3048_vm1, 0, %v3043_v16  ;;  %2323 = vsinq.f32 %v494_v50 }
  0xdc   :  { %v597_v4 = vsel %vm3074_vm4, %v2505_v8, %v594_v41  ;;  %v700_v51 = vsel %vm3080_vm5, %v2585_v46, %v697_v60  ;;  %vm2203_vm11 = vcmp.lt.s32.totalorder %v2202_v23, 0  ;;  %v976_v7 = vmul.u32 %v969_v58, %v960_v61 }
  0xdd   :  { %v1024_v10 = vand.u32 2147483647, %v2705_v3  ;;  %vm1035_vm12 = vcmp.gt.s32.totalorder %v1034_v30, 0  ;;  %v791_v15 = vsub.s32 4294967266, %v3118_v2  ;;  %vm978_vm13 = vc.u32 %v3111_v45, %v3113_v42 }
  0xde   :  { %v979_v16 = vadd.s32 1, %v3114_v35  ;;  %v1036_v33 = vsel %vm1035_vm12, %v1034_v30, 0  ;;  %v3137_v6 = vand.u32 3, %v3123_v26  ;;  %v3142_v52 = vsel %vm511_vm2, %v595_v27, %v2821_v9 }
  0xdf   :  { %2325 = vcosq.f32 %v597_v4  ;;  %v1038_v58 = vand.u32 31, %v1036_v33  ;;  %v771_v39 = vadd.s32 %v2897_v20, %v2906_v19  ;;  %v3146_v62 = vsel %vm2203_vm11, 0, %v2202_v23 }
  0xe0   :  { %2327 = vsinq.f32 %v597_v4  ;;  %v980_v31 = vsel %vm978_vm13, %v979_v16, %v3114_v35  ;;  %v1031_v37 = vand.u32 8388607, %v1024_v10  ;;  %v787_v9 = vsub.s32 32, %v3118_v2 }
  0xe1   :  { %2329 = vcosq.f32 %v700_v51  ;;  %v981_v50 = vadd.s32 %v980_v31, %v976_v7  ;;  %v1039_v24 = vsub.s32 32, %v1038_v58  ;;  %v792_v38 = vadd.s32 127, %v791_v15 }
  0xe2   :  { %2331 = vsinq.f32 %v700_v51  ;;  %v874_v41 = vadd.s32 %v2975_v63, %v2985_v28  ;;  %v894_v48 = vsub.s32 4294967266, %v3146_v62  ;;  %v1041_v19 = vshll.u32 %v3775_v12, %v1038_v58 }
  0xe3   :  { %v982_v20 = vadd.s32 536870912, %v981_v50  ;;  %v1044_v22 = vshll.u32 %v3776_v17, %v1038_v58  ;;  %v1042_v60 = vshrl.u32 %v3776_v17, %v1039_v24  ;;  %v1045_v23 = vshrl.u32 %v3778_v36, %v1039_v24 }
  0xe4   :  { %v1050_v61 = vshll.u32 %v3777_v43, %v1038_v58  ;;  %v1051_v47 = vshrl.u32 %v3779_v1, %v1039_v24  ;;  %v788_v29 = vshll.u32 %v3012_v32, %v3118_v2  ;;  %v1032_v63 = vor.u32 8388608, %v1031_v37 }
  0xe5   :  { %v3163_v35 = vshrl.u32 %v982_v20, 30  ;;  %v1037_v28 = vshrl.u32 %v1036_v33, 5  ;;  %v890_v27 = vsub.s32 32, %v3146_v62  ;;  %v1047_v30 = vshll.u32 %v3778_v36, %v1038_v58 }
  0xe6   :  { %v1048_v4 = vshrl.u32 %v3777_v43, %v1039_v24  ;;  %v1053_v17 = vshll.u32 %v3779_v1, %v1038_v58  ;;  %vm262_vm14 = vcmp.eq.f32.partialorder %v2791_v5, inf  ;;  %v789_v51 = vshrl.u32 %v771_v39, %v787_v9 }
  0xe7   :  { %v793_v7 = vshll.u32 %v792_v38, 23  ;;  %v895_v15 = vadd.s32 127, %v894_v48  ;;  %v984_v16 = vshll.u32 %v3163_v35, 30  ;;  %v3171_v32 = vpop.eup %2321  ;;  %v1043_v2 = vor.u32 %v1042_v60, %v1041_v19 }
  0xe8   :  { %v1046_v31 = vor.u32 %v1045_v23, %v1044_v22  ;;  %v1052_v33 = vor.u32 %v1051_v47, %v1050_v61  ;;  %v1054_v37 = vshrl.u32 %v3780_v14, %v1039_v24  ;;  %v3174_v20 = vpop.eup %2323  ;;  %v891_v43 = vshll.u32 %v3059_v13, %v3146_v62 }
  0xe9   :  { %v3178_v36 = vsub.s32 %v981_v50, %v984_v16  ;;  %v1040_v1 = vshrl.u32 %v3775_v12, %v1039_v24  ;;  %vm1056_vm15 = vcmp.lt.s32.totalorder %v1037_v28, 1  ;;  %v892_v58 = vshrl.u32 %v874_v41, %v890_v27 }
  0xea   :  { %v1049_v39 = vor.u32 %v1048_v4, %v1047_v30  ;;  %v1055_v9 = vor.u32 %v1054_v37, %v1053_v17  ;;  %v3181_v38 = vshll.u32 %v1032_v63, 8  ;;  %v896_v48 = vshll.u32 %v895_v15, 23 }
  0xeb   :  { %v987_v19 = vsub.s32 0, %v3178_v36  ;;  %vm1058_vm0 = vcmp.lt.s32.totalorder %v1037_v28, 3  ;;  %vm1059_vm1 = vcmp.lt.s32.totalorder %v1037_v28, 4  ;;  %vm1057_vm2 = vcmp.lt.s32.totalorder %v1037_v28, 2 }
  0xec   :  { %v3184_v14 = vpop.eup %2325  ;;  %v1061_v22 = vsel %vm1059_vm1, %v1049_v39, 2102212464  ;;  %v1064_v13 = vsel %vm1056_vm15, %v1043_v2, %v1046_v31  ;;  %v1065_v62 = vsel %vm1059_vm1, %v1052_v33, 920167782  ;;  %v790_v12 = vor.u32 %v789_v51, %v788_v29 }
  0xed   :  { %v3187_v50 = vpop.eup %2327  ;;  %v794_v24 = vor.u32 4788187, %v793_v7  ;;  %v2205_v41 = vmin.u32 %v987_v19, %v3178_v36  ;;  %v1060_v60 = vsel %vm1056_vm15, %v1040_v1, %v1043_v2  ;;  %v1062_v61 = vsel %vm1058_vm0, %v1046_v31, %v1061_v22 }
  0xee   :  { %v3191_v23 = vpop.eup %2329  ;;  %v1066_v47 = vsel %vm1058_vm0, %v1049_v39, %v1065_v62  ;;  %v1068_v63 = vsel %vm1056_vm15, %v1046_v31, %v1049_v39  ;;  %v1069_v27 = vsel %vm1059_vm1, %v1055_v9, 1326507024  ;;  %v893_v4 = vor.u32 %v892_v58, %v891_v43 }
  0xef   :  { %v3196_v30 = vpop.eup %2331  ;;  %v989_v17 = vclz %v2205_v41  ;;  %v1067_v29 = vsel %vm1057_vm2, %v1064_v13, %v1066_v47  ;;  %v1070_v51 = vsel %vm1058_vm0, %v1052_v33, %v1069_v27  ;;  %v897_v7 = vor.u32 4788187, %v896_v48 }
  0xf0   :  { %v1071_v15 = vsel %vm1057_vm2, %v1068_v63, %v1070_v51  ;;  %v3202_v16 = vmul.u32.u64.low %v3181_v38, %v1067_v29  ;;  %v3203_v2 = vmul.u32.u64.high %v3181_v38, %v1067_v29, %v3202_v16  ;;  %v1063_v31 = vsel %vm1057_vm2, %v1060_v60, %v1062_v61 }
  0xf1   :  { %v2206_v37 = vadd.s32 4294967294, %v989_v17  ;;  %v3208_v1 = vmul.u32.u64.low %v3181_v38, %v1071_v15  ;;  %v3209_v39 = vmul.u32.u64.high %v3181_v38, %v1071_v15, %v3208_v1  ;;  %v3215_v33 = vsel %vm262_vm14, %v2791_v5, %v3009_v0 }
  0xf2   :  { %vm401_vm6 = vcmp.eq.s32.totalorder %v3036_v59, 2  ;;  %v3221_v43 = vsel %vm3074_vm4, 0, %v3142_v52  ;;  %v698_v28 = vsub.s32 4, %v2826_v53  ;;  %vm398_vm7 = vcmp.eq.s32.totalorder %v3036_v59, 0 }
  0xf3   :  { %v795_v58 = vand.u32 2147483647, %v794_v24  ;;  %v797_v9 = vcvt.s32.f32 %v790_v12  ;;  %v977_v48 = vadd.s32 %v3113_v42, %v3111_v45  ;;  %vm2207_vm8 = vcmp.lt.s32.totalorder %v2206_v37, 0 }
  0xf4   :  { %v900_v19 = vcvt.s32.f32 %v893_v4  ;;  %v992_v0 = vsel %vm2207_vm8, 0, %v2206_v37  ;;  %v1079_v22 = vmul.u32 %v3181_v38, %v1063_v31  ;;  %v1082_v13 = vadd.s32 1, %v3203_v2 }
  0xf5   :  { %vm501_vm9 = vcmp.eq.s32.totalorder %v3137_v6, 0  ;;  %v898_v57 = vand.u32 2147483647, %v897_v7  ;;  %v993_v52 = vsub.s32 32, %v992_v0  ;;  %v994_v62 = vshll.u32 %v3178_v36, %v992_v0 }
  0xf6   :  { %v997_v41 = vsub.s32 4294967266, %v992_v0  ;;  %v3755_v24 = vxor.u32 2147483648, %v3093_v49  ;;  %v3233_v12 = vand.u32 3, %v3221_v43  ;;  %v699_v45 = vsel %vm614_vm3, %v698_v28, %v2826_v53 }
  0xf7   :  { %vm1081_vm4 = vc.u32 %v3209_v39, %v3202_v16  ;;  %v798_v42 = vmul.f32 %v797_v9, %v795_v58  ;;  %v995_v38 = vshrl.u32 %v977_v48, %v993_v52  ;;  %vm397_vm10 = vcmp.lt.s32.totalorder %v3036_v59, 2 }
  0xf8   :  { %v998_v60 = vadd.s32 127, %v997_v41  ;;  %v1083_v61 = vsel %vm1081_vm4, %v1082_v13, %v3203_v2  ;;  %vm504_vm11 = vcmp.eq.s32.totalorder %v3137_v6, 2  ;;  %v3799_v36 = vand.u32 2147483647, %v2672_v11 }
  0xf9   :  { %vm3747_vm3 = vcmp.lt.s32.totalorder %v2672_v11, 0  ;;  %v1084_v53 = vadd.s32 %v1083_v61, %v1079_v22  ;;  %v3756_v63 = vxor.u32 2147483648, %v3100_v25  ;;  %v901_v27 = vmul.f32 %v900_v19, %v898_v57 }
  0xfa   :  { %vm3245_vm12 = vcmp.le.f32.partialorder %v3799_v36, 0.7853982  ;;  %v996_v4 = vor.u32 %v995_v38, %v994_v62  ;;  %v999_v17 = vshll.u32 %v998_v60, 23  ;;  %v403_v29 = vsel %vm401_vm6, %v3755_v24, %v3100_v25 }
  0xfb   :  { %vm500_vm13 = vcmp.lt.s32.totalorder %v3137_v6, 2  ;;  %vm603_vm14 = vcmp.lt.s32.totalorder %v3233_v12, 2  ;;  %v3260_v51 = vsel %vm3080_vm5, 0, %v699_v45  ;;  %v1085_v7 = vadd.s32 536870912, %v1084_v53  ;;  %v3808_v6 = vld [vmem:[#allocation11_spill] sm:$0xff] }
  0xfc   :  { %v3753_v15 = vxor.u32 2147483648, %v3171_v32  ;;  %v799_v2 = vxor.u32 2147483648, %v798_v42  ;;  %v1000_v37 = vor.u32 4788187, %v999_v17  ;;  %v1003_v31 = vcvt.s32.f32 %v996_v4 }
  0xfd   :  { %vm395_vm15 = vweird.f32 %v2438_v18  ;;  %v3754_v1 = vxor.u32 2147483648, %v3174_v20  ;;  %vm604_vm0 = vcmp.eq.s32.totalorder %v3233_v12, 0  ;;  %vm607_vm1 = vcmp.eq.s32.totalorder %v3233_v12, 2  ;;  %v1976_v18 = vld [vmem:[#allocation4 + $0x8] sm:$0xff] }
  0xfe   :  { %v3267_v28 = vshrl.u32 %v1085_v7, 30  ;;  %vm257_vm2 = vcmp.eq.f32.partialorder %v2768_v34, 0.0  ;;  %vm498_vm5 = vweird.f32 %v2445_v54  ;;  %vm3760_vm6 = vweird.f32 %v2505_v8 }
  0xff   :  { %v3750_v55 = vxor.u32 2147483648, %v3184_v14  ;;  %v705_v58 = vand.u32 3, %v3260_v51  ;;  %v902_v9 = vxor.u32 2147483648, %v901_v27  ;;  %v1001_v48 = vand.u32 2147483647, %v1000_v37 }
 0x100   :  { %v400_v19 = vsel %vm398_vm7, %v3093_v49, %v3756_v63  ;;  %v3751_v0 = vxor.u32 2147483648, %v3187_v50  ;;  %vm3746_vm4 = vcmp.lt.s32.totalorder %v2690_v40, 0  ;;  %v1087_v22 = vshll.u32 %v3267_v28, 30  ;;  %v1975_v63 = vld [vmem:[#allocation4] sm:$0xff] }
 0x101   :  { %v506_v13 = vsel %vm504_vm11, %v3753_v15, %v3174_v20  ;;  %v800_v57 = vsel %vm3747_vm3, %v799_v2, %v798_v42  ;;  %v3802_v52 = vand.u32 2147483647, %v2690_v40  ;;  %v1004_v41 = vmul.f32 %v1003_v31, %v1001_v48 }
 0x102   :  { %v503_v45 = vsel %vm501_vm9, %v3171_v32, %v3754_v1  ;;  %v3749_v38 = vxor.u32 2147483648, %v3196_v30  ;;  %v3748_v60 = vxor.u32 2147483648, %v3191_v23  ;;  %v3303_v61 = vsub.s32 %v1084_v53, %v1087_v22  ;;  %v3827_v1 = vld [vmem:[#allocation19_spill] sm:$0xff] }
 0x103   :  { %vm3292_vm8 = vcmp.le.f32.partialorder %v3802_v52, 0.7853982  ;;  %v609_v42 = vsel %vm607_vm1, %v3750_v55, %v3187_v50  ;;  %vm707_vm7 = vcmp.eq.s32.totalorder %v705_v58, 0  ;;  %vm710_vm11 = vcmp.eq.s32.totalorder %v705_v58, 2 }
 0x104   :  { %v903_v36 = vsel %vm3746_vm4, %v902_v9, %v901_v27  ;;  %v606_v4 = vsel %vm604_vm0, %v3184_v14, %v3751_v0  ;;  %v803_v53 = vsel %vm3245_vm12, %v2672_v11, %v800_v57  ;;  %v1005_v17 = vxor.u32 2147483648, %v1004_v41 }
 0x105   :  { %v1090_v7 = vsub.s32 0, %v3303_v61  ;;  %v404_v2 = vsel %vm397_vm10, %v400_v19, %v403_v29  ;;  %vm3752_vm9 = vweird.f32 %v2585_v46  ;;  %vm706_vm1 = vcmp.lt.s32.totalorder %v705_v58, 2 }
 0x106   :  { %vm923_vm4 = vcmp.lt.s32.totalorder %v2692_v44, 0  ;;  %vm269_vm3 = vcmp.eq.f32.partialorder %v2797_v21, inf  ;;  %v709_v27 = vsel %vm707_vm7, %v3191_v23, %v3749_v38  ;;  %v712_v37 = vsel %vm710_vm11, %v3748_v60, %v3196_v30 }
 0x107   :  { %v906_v59 = vsel %vm3292_vm8, %v2690_v40, %v903_v36  ;;  %v2209_v29 = vmin.u32 %v1090_v7, %v3303_v61  ;;  %v507_v31 = vsel %vm500_vm13, %v503_v45, %v506_v13  ;;  %v610_v9 = vsel %vm603_vm14, %v606_v4, %v609_v42  ;;  %v3809_v45 = vld [vmem:[#allocation22_spill] sm:$0xff]  ;;  %v3810_v36 = vld [vmem:[#allocation20_spill] sm:$0xff] }
 0x108   :  { %v801_v48 = vsub.s32 4, %v2969_v56  ;;  %2333 = vcosq.f32 %v803_v53  ;;  %v3805_v19 = vand.u32 2147483647, %v2692_v44  ;;  %v1006_v57 = vsel %vm923_vm4, %v1005_v17, %v1004_v41 }
 0x109   :  { %2335 = vsinq.f32 %v803_v53  ;;  %v1092_v52 = vclz %v2209_v29  ;;  %vm271_vm0 = vcmp.eq.f32.partialorder %v2797_v21, 0.0  ;;  %vm276_vm13 = vcmp.eq.f32.partialorder %v3808_v6, inf }
 0x10a   :  { %vm3343_vm10 = vcmp.le.f32.partialorder %v3805_v19, 0.7853982  ;;  %v405_v12 = vsel %vm395_vm15, nan, %v404_v2  ;;  %v713_v13 = vsel %vm706_vm1, %v709_v27, %v712_v37  ;;  %v904_v42 = vsub.s32 4, %v3809_v45 }
 0x10b   :  { %2337 = vcosq.f32 %v906_v59  ;;  %v3811_v4 = vand.u32 2147483648, %v2768_v34  ;;  %v508_v41 = vsel %vm498_vm5, nan, %v507_v31  ;;  %v611_v17 = vsel %vm3760_vm6, nan, %v610_v9  ;;  %v3815_v31 = vld [vmem:[#allocation14_spill] sm:$0xff] }
 0x10c   :  { %v2210_v7 = vadd.s32 4294967294, %v1092_v52  ;;  %v3812_v58 = vand.u32 2147483648, %v2791_v5  ;;  %vm3813_vm14 = vcmp.eq.f32.partialorder %v2791_v5, 0.0  ;;  %vm3814_vm7 = vcmp.lt.s32.totalorder %v2672_v11, 0 }
 0x10d   :  { %v3360_v53 = vsel %vm257_vm2, %v3811_v4, %v3810_v36  ;;  %v802_v34 = vsel %vm3814_vm7, %v801_v48, %v2969_v56  ;;  %2339 = vsinq.f32 %v906_v59  ;;  %v1009_v27 = vsel %vm3343_vm10, %v2692_v44, %v1006_v57  ;;  %v3817_v56 = vld [vmem:[#allocation18_spill] sm:$0xff]  ;;  %v3819_v36 = vld [vmem:[#allocation15_spill] sm:$0xff] }
 0x10e   :  { %v3371_v2 = vsel %vm3813_vm14, %v3812_v58, %v3215_v33  ;;  %v714_v37 = vsel %vm3752_vm9, nan, %v713_v13  ;;  %v1080_v29 = vadd.s32 %v3202_v16, %v3209_v39  ;;  %vm2211_vm2 = vcmp.lt.s32.totalorder %v2210_v7, 0  ;;  %v3818_v16 = vld [vmem:[#allocation12_spill] sm:$0xff] }
 0x10f   :  { %v1127_v5 = vmul.f32 %v405_v12, %v3815_v31  ;;  %vm3816_vm11 = vcmp.lt.s32.totalorder %v2690_v40, 0  ;;  %v1095_v9 = vsel %vm2211_vm2, 0, %v2210_v7  ;;  %v1128_v59 = vmul.f32 %v508_v41, %v3817_v56 }
 0x110   :  { %v905_v33 = vsel %vm3816_vm11, %v904_v42, %v3809_v45  ;;  %v1129_v48 = vmul.f32 %v611_v17, %v3360_v53  ;;  %2341 = vcosq.f32 %v1009_v27  ;;  %v1096_v19 = vsub.s32 32, %v1095_v9  ;;  %v3820_v17 = vld [vmem:[#allocation21_spill] sm:$0xff] }
 0x111   :  { %v1097_v57 = vshll.u32 %v3303_v61, %v1095_v9  ;;  %v1100_v52 = vsub.s32 4294967266, %v1095_v9  ;;  %v279_v13 = vand.u32 2147483648, %v3808_v6  ;;  %2343 = vsinq.f32 %v1009_v27 }
 0x112   :  { %v1130_v12 = vmul.f32 %v714_v37, %v3371_v2  ;;  %v275_v45 = vmul.f32 %v3819_v36, %v3808_v6  ;;  %v3397_v42 = vsel %vm3245_vm12, 0, %v802_v34  ;;  %v1098_v4 = vshrl.u32 %v1080_v29, %v1096_v19  ;;  %v3821_v34 = vld [vmem:[#allocation16_spill] sm:$0xff]  ;;  %v3822_v19 = vld [vmem:[#allocation13_spill] sm:$0xff] }
 0x113   :  { %v1101_v41 = vadd.s32 127, %v1100_v52  ;;  %v270_v61 = vsel %vm269_vm3, %v2797_v21, %v3820_v17  ;;  %v3405_v7 = vsel %vm3292_vm8, 0, %v905_v33  ;;  %v1007_v58 = vsub.s32 4, %v3163_v35 }
 0x114   :  { %v1979_v27 = vmul.f32 1.4142135, %v1127_v5  ;;  %v1099_v37 = vor.u32 %v1098_v4, %v1097_v57  ;;  %v1980_v36 = vmul.f32 1.4142135, %v1128_v59  ;;  %v1981_v47 = vmul.f32 1.4142135, %v1129_v48 }
 0x115   :  { %v1102_v9 = vshll.u32 %v1101_v41, 23  ;;  %v3410_v29 = vmul.f32 %v3821_v34, %v3818_v16  ;;  %v3414_v60 = vand.u32 3, %v3397_v42  ;;  %v1982_v17 = vmul.f32 1.4142135, %v1130_v12  ;;  %v3416_v62 = vpop.eup %2333  ;;  %v3824_v12 = vld [vmem:[#allocation17_spill] sm:$0xff] }
 0x116   :  { %v3823_v33 = vand.u32 2147483648, %v2797_v21  ;;  %v3427_v59 = vsel %vm276_vm13, %v3808_v6, %v275_v45  ;;  %v1106_v57 = vcvt.s32.f32 %v1099_v37  ;;  %v3429_v4 = vpop.eup %2335  ;;  %vm283_vm12 = vcmp.eq.f32.partialorder %v3818_v16, inf }
 0x117   :  { %v1103_v48 = vor.u32 4788187, %v1102_v9  ;;  %v3434_v41 = vmul.f32 %v3824_v12, %v3822_v19  ;;  %v3437_v34 = vand.u32 3, %v3405_v7  ;;  %v1008_v21 = vsel %vm923_vm4, %v1007_v58, %v3163_v35 }
 0x118   :  { %v3422_v5 = vsel %vm271_vm0, %v3823_v33, %v270_v61  ;;  %v1987_v61 = vadd.f32 2.0, %v1979_v27  ;;  %v3442_v45 = vpop.eup %2337  ;;  %v1988_v37 = vadd.f32 2.0, %v1980_v36  ;;  %v1989_v33 = vadd.f32 2.0, %v1981_v47 }
 0x119   :  { %v1104_v9 = vand.u32 2147483647, %v1103_v48  ;;  %v1990_v38 = vadd.f32 2.0, %v1982_v17  ;;  %vm809_vm3 = vcmp.lt.s32.totalorder %v3414_v60, 2  ;;  %vm810_vm8 = vcmp.eq.s32.totalorder %v3414_v60, 0 }
 0x11a   :  { %vm813_vm1 = vcmp.eq.s32.totalorder %v3414_v60, 2  ;;  %vm1026_vm0 = vcmp.lt.s32.totalorder %v2705_v3, 0  ;;  %v3448_v12 = vpop.eup %2339  ;;  %v3757_v55 = vxor.u32 2147483648, %v3416_v62  ;;  %vm3453_vm4 = vcmp.le.f32.partialorder %v1024_v10, 0.7853982 }
 0x11b   :  { %v1107_v58 = vmul.f32 %v1106_v57, %v1104_v9  ;;  %v2404_v27 = vmov 1983009808   ;;  %vm278_vm13 = vcmp.eq.f32.partialorder %v3808_v6, 0.0  ;;  %vm290_vm14 = vcmp.eq.f32.partialorder %v3822_v19, inf }
 0x11c   :  { %v2006_v36 = vunpack.c.l.s4 %v2404_v27  ;;  %v3758_v47 = vxor.u32 2147483648, %v3429_v4  ;;  %vm916_vm7 = vcmp.eq.s32.totalorder %v3437_v34, 2  ;;  %v3759_v17 = vxor.u32 2147483648, %v3442_v45 }
 0x11d   :  { %v3464_v48 = vsel %vm3343_vm10, 0, %v1008_v21  ;;  %vm285_vm2 = vcmp.eq.f32.partialorder %v3818_v16, 0.0  ;;  %v1108_v10 = vxor.u32 2147483648, %v1107_v58  ;;  %v2003_v57 = vcombine.low %v1987_v61, %v1988_v37  ;;  %v3467_v0 = vpop.eup %2341  ;;  %v3828_v37 = vld [vmem:[#allocation10_spill] sm:$0xff] }
 0x11e   :  { %v2004_v9 = vcombine.low %v1989_v33, %v1990_v38  ;;  %v2007_v27 = vunpack.c.0.s8 %v2006_v36  ;;  %vm912_vm11 = vcmp.lt.s32.totalorder %v3437_v34, 2  ;;  %vm913_vm9 = vcmp.eq.s32.totalorder %v3437_v34, 0  ;;  %v3473_v22 = vpop.eup %2343 }
 0x11f   :  { %v3761_v15 = vxor.u32 2147483648, %v3448_v12  ;;  %v1228_v24 = vadd.s32 3, %v3827_v1  ;;  %vm292_vm10 = vcmp.eq.f32.partialorder %v3822_v19, 0.0  ;;  %v815_v38 = vsel %vm813_vm1, %v3757_v55, %v3429_v4 }
 0x120   :  { %v1014_v21 = vand.u32 3, %v3464_v48  ;;  %v1109_v61 = vsel %vm1026_vm0, %v1108_v10, %v1107_v58  ;;  %v3485_v33 = vsub.s32 %v2007_v27, %v3828_v37  ;;  %v812_v1 = vsel %vm810_vm8, %v3416_v62, %v3758_v47 }
 0x121   :  { %v918_v36 = vsel %vm916_vm7, %v3759_v17, %v3448_v12  ;;  %v1110_v55 = vsub.s32 4, %v3267_v28  ;;  %v1112_v58 = vsel %vm3453_vm4, %v2705_v3, %v1109_v61  ;;  %v1977_v10 = vmul.f32 0.9, %v1975_v63 }
 0x122   :  { %2345 = vcosq.f32 %v1112_v58  ;;  %v2011_v27 = vrot.slane %v2003_v57, %v3485_v33  ;;  %v2018_v37 = vrot.slane %v2004_v9, %v3485_v33  ;;  %v915_v47 = vsel %vm913_vm9, %v3442_v45, %v3761_v15 }
 0x123   :  { %v1017_v17 = vxor.u32 2147483648, %v3473_v22  ;;  %v1020_v52 = vxor.u32 2147483648, %v3467_v0  ;;  %2347 = vsinq.f32 %v1112_v58  ;;  %v284_v63 = vsel %vm283_vm12, %v3818_v16, %v3410_v29 }
 0x124   :  { %vm1016_vm8 = vcmp.eq.s32.totalorder %v1014_v21, 0  ;;  %vm1019_vm1 = vcmp.eq.s32.totalorder %v1014_v21, 2  ;;  %v2019_v57 = vcombine.low %v2011_v27, %v2018_v37  ;;  %vm807_vm7 = vweird.f32 %v2672_v11 }
 0x125   :  { %vm3763_vm6 = vweird.f32 %v2690_v40  ;;  %v1111_v9 = vsel %vm1026_vm0, %v1110_v55, %v3267_v28  ;;  %v1332_v61 = vadd.s32 3, %v3123_v26  ;;  %v816_v58 = vsel %vm809_vm3, %v812_v1, %v815_v38 }
 0x126   :  { %v919_v15 = vsel %vm912_vm11, %v915_v47, %v918_v36  ;;  %v3524_v29 = vand.u32 3, %v1228_v24  ;;  %v3526_v39 = vadd.f32 %v2019_v57, %v1977_v10  ;;  %vm1015_vm9 = vcmp.lt.s32.totalorder %v1014_v21, 2 }
 0x127   :  { %v1018_v27 = vsel %vm1016_vm8, %v3467_v0, %v1017_v17  ;;  %v1021_v28 = vsel %vm1019_vm1, %v1020_v52, %v3473_v22  ;;  %v1436_v26 = vadd.s32 3, %v3221_v43  ;;  %v3540_v24 = vsel %vm278_vm13, %v279_v13, %v3427_v59 }
 0x128   :  { %v291_v55 = vsel %vm290_vm14, %v3822_v19, %v3434_v41  ;;  %v3548_v60 = vsel %vm3453_vm4, 0, %v1111_v9  ;;  %v2041_v34 = vmax.f32 %v3526_v39, 0.0  ;;  %v3829_v43 = vand.u32 2147483648, %v3818_v16 }
 0x129   :  { %v817_v6 = vsel %vm807_vm7, nan, %v816_v58  ;;  %v920_v13 = vsel %vm3763_vm6, nan, %v919_v15  ;;  %v1333_v59 = vand.u32 3, %v1332_v61  ;;  %vm3762_vm12 = vweird.f32 %v2692_v44 }
 0x12a   :  { %v3555_v47 = vsel %vm285_vm2, %v3829_v43, %v284_v63  ;;  %v1022_v41 = vsel %vm1015_vm9, %v1018_v27, %v1021_v28  ;;  %v1540_v35 = vadd.s32 3, %v3260_v51  ;;  %v3565_v38 = vadd.f32 2.25, %v2041_v34 }
 0x12b   :  { %v3830_v16 = vand.u32 2147483648, %v3822_v19  ;;  %v1117_v1 = vand.u32 3, %v3548_v60  ;;  %vm1231_vm3 = vcmp.eq.s32.totalorder %v3524_v29, 0  ;;  %v1437_v15 = vand.u32 3, %v1436_v26 }
 0x12c   :  { %vm1116_vm0 = vweird.f32 %v2705_v3  ;;  %v1131_v36 = vmul.f32 %v817_v6, %v3422_v5  ;;  %v1132_v51 = vmul.f32 %v920_v13, %v3540_v24  ;;  %2349 = vrsqrt.f32 %v3565_v38 }
 0x12d   :  { %v3571_v21 = vsel %vm292_vm10, %v3830_v16, %v291_v55  ;;  %v1023_v10 = vsel %vm3762_vm12, nan, %v1022_v41  ;;  %vm1230_vm4 = vcmp.lt.s32.totalorder %v3524_v29, 2  ;;  %vm1234_vm13 = vcmp.eq.s32.totalorder %v3524_v29, 2 }
 0x12e   :  { %vm1334_vm14 = vcmp.lt.s32.totalorder %v1333_v59, 2  ;;  %v3831_v19 = vxor.u32 2147483648, %v3100_v25  ;;  %vm1335_vm2 = vcmp.eq.s32.totalorder %v1333_v59, 0  ;;  %vm1338_vm11 = vcmp.eq.s32.totalorder %v1333_v59, 2 }
 0x12f   :  { %v1541_v63 = vand.u32 3, %v1540_v35  ;;  %v3586_v57 = vpop.eup %2345  ;;  %vm1119_vm10 = vcmp.eq.s32.totalorder %v1117_v1, 0  ;;  %vm1122_vm8 = vcmp.eq.s32.totalorder %v1117_v1, 2  ;;  %vm1439_vm1 = vcmp.eq.s32.totalorder %v1437_v15, 0 }
 0x130   :  { %v1233_v37 = vsel %vm1231_vm3, %v3093_v49, %v3831_v19  ;;  %vm1442_vm9 = vcmp.eq.s32.totalorder %v1437_v15, 2  ;;  %v3588_v9 = vpop.eup %2347  ;;  %v3764_v61 = vxor.u32 2147483648, %v3586_v57  ;;  %v1133_v58 = vmul.f32 %v1023_v10, %v3555_v47 }
 0x131   :  { %v1983_v27 = vmul.f32 1.4142135, %v1131_v36  ;;  %v1984_v28 = vmul.f32 1.4142135, %v1132_v51  ;;  %vm1118_vm12 = vcmp.lt.s32.totalorder %v1117_v1, 2  ;;  %v1120_v26 = vxor.u32 2147483648, %v3588_v9 }
 0x132   :  { %v3832_v55 = vxor.u32 2147483648, %v3093_v49  ;;  %v3833_v6 = vxor.u32 2147483648, %v3174_v20  ;;  %v1124_v41 = vsel %vm1122_vm8, %v3764_v61, %v3588_v9  ;;  %v3834_v35 = vxor.u32 2147483648, %v3171_v32 }
 0x133   :  { %vm1543_vm3 = vcmp.eq.s32.totalorder %v1541_v63, 0  ;;  %vm1546_vm6 = vcmp.eq.s32.totalorder %v1541_v63, 2  ;;  %v1121_v49 = vsel %vm1119_vm10, %v3586_v57, %v1120_v26  ;;  %v3836_v51 = vxor.u32 2147483648, %v3184_v14 }
 0x134   :  { %v1236_v43 = vsel %vm1234_vm13, %v3832_v55, %v3100_v25  ;;  %v1337_v13 = vsel %vm1335_vm2, %v3171_v32, %v3833_v6  ;;  %v1340_v16 = vsel %vm1338_vm11, %v3834_v35, %v3174_v20  ;;  %vm1438_vm13 = vcmp.lt.s32.totalorder %v1437_v15, 2 }
 0x135   :  { %v3835_v25 = vxor.u32 2147483648, %v3187_v50  ;;  %v1444_v32 = vsel %vm1442_vm9, %v3836_v51, %v3187_v50  ;;  %v1125_v10 = vsel %vm1118_vm12, %v1121_v49, %v1124_v41  ;;  %v1985_v20 = vmul.f32 1.4142135, %v1133_v58 }
 0x136   :  { %v1991_v19 = vadd.f32 2.0, %v1983_v27  ;;  %v1992_v55 = vadd.f32 2.0, %v1984_v28  ;;  %v1126_v6 = vsel %vm1116_vm0, nan, %v1125_v10  ;;  %vm1542_vm2 = vcmp.lt.s32.totalorder %v1541_v63, 2 }
 0x137   :  { %v1441_v36 = vsel %vm1439_vm1, %v3184_v14, %v3835_v25  ;;  %v3837_v1 = vxor.u32 2147483648, %v3196_v30  ;;  %v3838_v25 = vxor.u32 2147483648, %v3191_v23  ;;  %v1134_v14 = vmul.f32 %v1126_v6, %v3571_v21 }
 0x138   :  { %v1237_v50 = vsel %vm1230_vm4, %v1233_v37, %v1236_v43  ;;  %v1341_v15 = vsel %vm1334_vm14, %v1337_v13, %v1340_v16  ;;  %v1445_v58 = vsel %vm1438_vm13, %v1441_v36, %v1444_v32  ;;  %v1993_v41 = vadd.f32 2.0, %v1985_v20 }
 0x139   :  { %v1545_v35 = vsel %vm1543_vm3, %v3191_v23, %v3837_v1  ;;  %v1548_v61 = vsel %vm1546_vm6, %v3838_v25, %v3196_v30  ;;  %v1986_v28 = vmul.f32 1.4142135, %v1134_v14  ;;  %v2020_v63 = vcombine.low %v1991_v19, %v1992_v55  ;;  %v2350_v49 = vpop.eup %2349 }
 0x13a   :  { %v1549_v27 = vsel %vm1542_vm2, %v1545_v35, %v1548_v61  ;;  %v1238_v51 = vsel %vm395_vm15, nan, %v1237_v50  ;;  %v1342_v23 = vsel %vm498_vm5, nan, %v1341_v15  ;;  %vm2047_vm6 = vcmp.eq.f32.partialorder %v3565_v38, inf }
 0x13b   :  { %v2050_v30 = vand.u32 2147483648, %v3565_v38  ;;  %vm3839_vm12 = vweird.f32 %v2505_v8  ;;  %v1994_v59 = vadd.f32 2.0, %v1986_v28  ;;  %v2046_v37 = vmul.f32 %v2350_v49, %v3565_v38 }
 0x13c   :  { %v1446_v29 = vsel %vm3839_vm12, nan, %v1445_v58  ;;  %vm2049_vm4 = vcmp.eq.f32.partialorder %v3565_v38, 0.0  ;;  %vm3840_vm14 = vweird.f32 %v2585_v46  ;;  %v1967_v43 = vmul.f32 %v1238_v51, %v3815_v31 }
 0x13d   :  { %v1550_v61 = vsel %vm3840_vm14, nan, %v1549_v27  ;;  %v2021_v54 = vcombine.low %v1993_v41, %v1994_v59  ;;  %v2028_v13 = vrot.slane %v2020_v63, %v3485_v33  ;;  %v2048_v16 = vsel %vm2047_vm6, %v3565_v38, %v2046_v37 }
 0x13e   :  { %v1968_v36 = vmul.f32 %v1342_v23, %v3817_v56  ;;  %v1969_v8 = vmul.f32 %v1446_v29, %v3360_v53  ;;  %v2051_v32 = vsel %vm2049_vm4, %v2050_v30, %v2048_v16  ;;  %v1978_v10 = vmul.f32 0.9, %v1976_v18 }
 0x13f   :  { %v2035_v20 = vrot.slane %v2021_v54, %v3485_v33  ;;  %v2061_v19 = vcombine.high %v2051_v32, %v2051_v32  ;;  %v2068_v46 = vrot.slane %v2051_v32, %v3485_v33  ;;  %v1970_v55 = vmul.f32 %v1550_v61, %v3371_v2 }
 0x140   :  { %v1644_v53 = vadd.s32 3, %v3397_v42  ;;  %v1748_v27 = vadd.s32 3, %v3405_v7  ;;  %v1852_v2 = vadd.s32 3, %v3464_v48  ;;  %v1956_v51 = vadd.s32 3, %v3548_v60 }
 0x141   :  { %v2036_v6 = vcombine.low %v2028_v13, %v2035_v20  ;;  %v2075_v31 = vrot.slane %v2061_v19, %v3485_v33  ;;  %v2076_v1 = vcombine.high %v2068_v46, %v2068_v46  ;;  %v2103_v35 = vmul.f32 %v2068_v46, %v1967_v43 }
 0x142   :  { %v1645_v49 = vand.u32 3, %v1644_v53  ;;  %v1749_v23 = vand.u32 3, %v1748_v27  ;;  %v1853_v30 = vand.u32 3, %v1852_v2  ;;  %v1957_v7 = vand.u32 3, %v1956_v51 }
 0x143   :  { %v3654_v25 = vadd.f32 %v2036_v6, %v1978_v10  ;;  %v2077_v38 = vcombine.high %v2075_v31, %v2075_v31  ;;  %v2104_v56 = vmul.f32 %v2076_v1, %v1968_v36  ;;  %v2105_v14 = vmul.f32 %v2075_v31, %v1969_v8 }
 0x144   :  { %vm1647_vm15 = vcmp.eq.s32.totalorder %v1645_v49, 0  ;;  %vm1650_vm5 = vcmp.eq.s32.totalorder %v1645_v49, 2  ;;  %vm1751_vm11 = vcmp.eq.s32.totalorder %v1749_v23, 0  ;;  %vm1754_vm10 = vcmp.eq.s32.totalorder %v1749_v23, 2 }
 0x145   :  { %v2042_v50 = vmax.f32 %v3654_v25, 0.0  ;;  %v2106_v15 = vmul.f32 %v2077_v38, %v1970_v55  ;;  %v2119_v58 = vcombine.low %v2103_v35, %v2104_v56  ;;  %vm1646_vm8 = vcmp.lt.s32.totalorder %v1645_v49, 2 }
 0x146   :  { %vm1855_vm1 = vcmp.eq.s32.totalorder %v1853_v30, 0  ;;  %vm1858_vm9 = vcmp.eq.s32.totalorder %v1853_v30, 2  ;;  %v3841_v59 = vxor.u32 2147483648, %v3429_v4  ;;  %v3842_v37 = vxor.u32 2147483648, %v3416_v62 }
 0x147   :  { %v2044_v28 = vadd.f32 2.25, %v2042_v50  ;;  %v2120_v41 = vcombine.low %v2105_v14, %v2106_v15  ;;  %v2127_v63 = vrot.slane %v2119_v58, %v3485_v33  ;;  %vm1750_vm3 = vcmp.lt.s32.totalorder %v1749_v23, 2 }
 0x148   :  { %v1649_v60 = vsel %vm1647_vm15, %v3416_v62, %v3841_v59  ;;  %v1652_v61 = vsel %vm1650_vm5, %v3842_v37, %v3429_v4  ;;  %v3843_v43 = vxor.u32 2147483648, %v3448_v12  ;;  %v3844_v39 = vxor.u32 2147483648, %v3442_v45 }
 0x149   :  { %2351 = vrsqrt.f32 %v2044_v28  ;;  %v2134_v42 = vrot.slane %v2120_v41, %v3485_v33  ;;  %vm1959_vm13 = vcmp.eq.s32.totalorder %v1957_v7, 0  ;;  %vm1962_vm2 = vcmp.eq.s32.totalorder %v1957_v7, 2 }
 0x14a   :  { %v1753_v54 = vsel %vm1751_vm11, %v3442_v45, %v3843_v43  ;;  %vm1854_vm6 = vcmp.lt.s32.totalorder %v1853_v30, 2  ;;  %v1857_v13 = vsel %vm1855_vm1, %v3467_v0, %v1017_v17  ;;  %v1860_v62 = vsel %vm1858_vm9, %v1020_v52, %v3473_v22 }
 0x14b   :  { %v2135_v29 = vcombine.low %v2127_v63, %v2134_v42  ;;  %v1653_v16 = vsel %vm1646_vm8, %v1649_v60, %v1652_v61  ;;  %vm1958_vm12 = vcmp.lt.s32.totalorder %v1957_v7, 2  ;;  %v1961_v36 = vsel %vm1959_vm13, %v3586_v57, %v1120_v26 }
 0x14c   :  { %v3845_v45 = vxor.u32 2147483648, %v3586_v57  ;;  %v1861_v10 = vsel %vm1854_vm6, %v1857_v13, %v1860_v62  ;;  %v1654_v17 = vsel %vm807_vm7, nan, %v1653_v16  ;;  %vm2054_vm4 = vcmp.eq.f32.partialorder %v2044_v28, inf }
 0x14d   :  { %v2155_v48 = vadd.f32 %v2135_v29, %v2041_v34  ;;  %v1756_v34 = vsel %vm1754_vm10, %v3844_v39, %v3448_v12  ;;  %v2057_v0 = vand.u32 2147483648, %v2044_v28  ;;  %vm2056_vm14 = vcmp.eq.f32.partialorder %v2044_v28, 0.0 }
 0x14e   :  { %v1964_v12 = vsel %vm1962_vm2, %v3845_v45, %v3588_v9  ;;  %v1757_v32 = vsel %vm1750_vm3, %v1753_v54, %v1756_v34  ;;  %vm3846_vm15 = vweird.f32 %v2690_v40  ;;  %vm3847_vm5 = vweird.f32 %v2692_v44 }
 0x14f   :  { %v2157_v18 = vmul.f32 0.5, %v2155_v48  ;;  %v1965_v52 = vsel %vm1958_vm12, %v1961_v36, %v1964_v12  ;;  %v1758_v26 = vsel %vm3846_vm15, nan, %v1757_v32  ;;  %v1862_v57 = vsel %vm3847_vm5, nan, %v1861_v10 }
 0x150   :  { %v1971_v9 = vmul.f32 %v1654_v17, %v3422_v5  ;;  %v1966_v46 = vsel %vm1116_vm0, nan, %v1965_v52  ;;  %v1972_v55 = vmul.f32 %v1758_v26, %v3540_v24  ;;  %v1973_v6 = vmul.f32 %v1862_v57, %v3555_v47 }
 0x151   :  { %v2159_v4 = vmax.f32 %v2157_v18, 0.0  ;;  %v1974_v40 = vmul.f32 %v1966_v46, %v3571_v21 }
 0x153   :  { %v2161_v8 = vmin.f32 %v2159_v4, 4095.0 }
 0x155   :  { %2163 = vst [vmem:[#allocation7] sm:$0xff] %v2161_v8 }
 0x156   :  { %v2352_v20 = vpop.eup %2351 }
 0x157   :  { %v2053_v22 = vmul.f32 %v2352_v20, %v2044_v28 }
 0x159   :  { %v2055_v19 = vsel %vm2054_vm4, %v2044_v28, %v2053_v22 }
 0x15a   :  { %v2058_v11 = vsel %vm2056_vm14, %v2057_v0, %v2055_v19 }
 0x15b   :  { %v2078_v31 = vcombine.high %v2058_v11, %v2058_v11  ;;  %v2085_v1 = vrot.slane %v2058_v11, %v3485_v33 }
 0x15d   :  { %v2092_v35 = vrot.slane %v2078_v31, %v3485_v33  ;;  %v2093_v44 = vcombine.high %v2085_v1, %v2085_v1  ;;  %v2107_v38 = vmul.f32 %v2085_v1, %v1971_v9 }
 0x15f   :  { %v2094_v56 = vcombine.high %v2092_v35, %v2092_v35  ;;  %v2108_v5 = vmul.f32 %v2093_v44, %v1972_v55  ;;  %v2109_v14 = vmul.f32 %v2092_v35, %v1973_v6 }
 0x161   :  { %v2110_v53 = vmul.f32 %v2094_v56, %v1974_v40  ;;  %v2136_v3 = vcombine.low %v2107_v38, %v2108_v5 }
 0x163   :  { %v2137_v15 = vcombine.low %v2109_v14, %v2110_v53  ;;  %v2144_v58 = vrot.slane %v2136_v3, %v3485_v33 }
 0x165   :  { %v2151_v24 = vrot.slane %v2137_v15, %v3485_v33 }
 0x167   :  { %v2152_v47 = vcombine.low %v2144_v58, %v2151_v24 }
 0x169   :  { %v2156_v27 = vadd.f32 %v2152_v47, %v2042_v50 }
 0x16b   :  { %v2158_v2 = vmul.f32 0.5, %v2156_v27 }
 0x16d   :  { %v2160_v21 = vmax.f32 %v2158_v2, 0.0 }
 0x16f   :  { %v2162_v28 = vmin.f32 %v2160_v21, 4095.0 }
 0x171   :  { %2164 = vst [vmem:[#allocation7 + $0x8] sm:$0xff] %v2162_v28 }
 0x172   :  { %2384 = shalt.err (!%p2381_p9)
}
 0x173   :  { %2174 = dma.vmem_to_hbm [thread:$0]  %s2172_s1, 256, %s3714_s2, [#allocation6]  }
 0x174   :  { %2395 = dma.done.wait [#allocation6], 256  }
 0x175   :  { %2396 = vsyncadd [#allocation6], 4294967040 }
 0x176   :  { %2178 = vsyncpa [#allocation5], 1 }
 0x177   :  { %2179 = vsyncpa [#allocation6], 1 }

</bundles_post_ra>
